<compile_context>
chip_gen: v7x
topology: tpu7x:2x2x1
jax: 0.10.0
libtpu: 0.0.40
codegen_flags: <defaults>
</compile_context>

<pallas_src>
import jax
import jax.numpy as jnp
import numpy as np
from jax.experimental import pallas as pl
from jax.experimental.pallas import tpu as pltpu

# Model hyper-parameters (MNISTModel(input_dim=256, hidden_dims=[64, 32], num_classes=10))
HIDDEN_DIMS = [64, 32]
NUM_CLASSES = 10
LANE = 128        # lane-padded logits width
BB_MAX = 128      # batch block per grid step (lane-dense layouts keep VMEM ~10 MiB)


# ----------------------------------------------------------------------------
# Fused kernel: conv1 -> relu -> pool -> conv2 -> relu -> pool -> fc1/2/3
# ----------------------------------------------------------------------------
def mnist_fused_kernel(x_ref, w1_ref, b1_ref, w2_ref, b2_ref,
                       wf1_ref, bf1_ref, wf2_ref, bf2_ref, wf3_ref, bf3_ref,
                       o_ref):
    """Whole forward for one batch block; all intermediates lane-dense in VMEM.

    x_ref  : [BB, 28, 28]   f32   input images
    w1_ref : [5, 28, 256]   f32   conv1 banded (Toeplitz) weights per kernel row;
                                  out lane = w_parity*128 + pooledW*6 + cout
    b1_ref : [1, 256]       f32   conv1 bias tiled into the same lane layout
    w2_ref : [5, 128, 256]  bf16  conv2 banded weights per kernel row;
                                  in lane = pooledW*6 + cin (72 used),
                                  out lane = w_parity*128 + pooledW2*16 + cout
    b2_ref : [1, 256]       f32
    wf1_ref: [4, 128, 64]   bf16  fc1 split per pooled H row (PyTorch flatten order baked in)
    wf2_ref: [64, 32]       bf16
    wf3_ref: [32, 128]      bf16  zero-padded to 128 logits lanes
    o_ref  : [BB, 128]      f32   lane-dense padded logits
    """
    BB = x_ref.shape[0]
    x = x_ref[...]                                                  # [BB, 28, 28]

    # ---- conv1 (1 -> 6, 5x5 valid) as 5 banded matmuls + bias + ReLU --------
    acc1 = jnp.zeros((BB * 24, 256), jnp.float32)
    for kh in range(5):
        lhs = x[:, kh:kh + 24, :].reshape(BB * 24, 28)              # rows = (b, oh)
        acc1 = acc1 + jnp.dot(lhs, w1_ref[kh],
                              preferred_element_type=jnp.float32)
    a1 = jnp.maximum(acc1 + b1_ref[...], 0.0)                       # [BB*24, 256]

    # ---- maxpool 2x2/2: lane-half max (W) + row-pair max (H) ----------------
    a1w = jnp.maximum(a1[:, :128], a1[:, 128:])                     # [BB*24, 128]
    a1w = a1w.reshape(BB, 12, 2, 128)
    h1 = jnp.maximum(a1w[:, :, 0, :], a1w[:, :, 1, :])              # [BB, 12, 128]
    h1 = h1.astype(jnp.bfloat16)                                    # cast once

    # ---- conv2 (6 -> 16, 5x5 valid) as 5 banded matmuls + bias + ReLU -------
    acc2 = jnp.zeros((BB * 8, 256), jnp.float32)
    for kh in range(5):
        lhs = h1[:, kh:kh + 8, :].reshape(BB * 8, 128)              # rows = (b, oh2)
        acc2 = acc2 + jnp.dot(lhs, w2_ref[kh],
                              preferred_element_type=jnp.float32)
    a2 = jnp.maximum(acc2 + b2_ref[...], 0.0)                       # [BB*8, 256]

    # ---- maxpool 2x2/2, same parity-halves trick -----------------------------
    a2w = jnp.maximum(a2[:, :128], a2[:, 128:])                     # [BB*8, 128]
    a2w = a2w.reshape(BB, 4, 2, 128)
    p2 = jnp.maximum(a2w[:, :, 0, :], a2w[:, :, 1, :])              # [BB, 4, 128]
    p2 = p2.astype(jnp.bfloat16)

    # ---- fc1 over the flattened pooled map: 4 matmuls with K = 128 ----------
    accf = jnp.zeros((BB, HIDDEN_DIMS[0]), jnp.float32)
    for ph in range(4):
        accf = accf + jnp.dot(p2[:, ph, :], wf1_ref[ph],
                              preferred_element_type=jnp.float32)
    h = jnp.maximum(accf + bf1_ref[...], 0.0).astype(jnp.bfloat16)  # [BB, 64]

    # ---- fc2 -> ReLU -> fc3 (single lane-dense store) ------------------------
    h = jnp.dot(h, wf2_ref[...], preferred_element_type=jnp.float32) + bf2_ref[...]
    h = jnp.maximum(h, 0.0).astype(jnp.bfloat16)                    # [BB, 32]
    logits = jnp.dot(h, wf3_ref[...], preferred_element_type=jnp.float32) + bf3_ref[...]
    o_ref[...] = logits                                             # [BB, 128]


# ----------------------------------------------------------------------------
# Host-side parameter packing (layout, pooling parity split and PyTorch
# flatten order are all folded into the weights; runs eagerly with numpy).
# ----------------------------------------------------------------------------
def _pack_params(params):
    f32 = np.float32
    # conv1 as banded matmul weights: W1[kh, iw, lane], lane = par*128 + pw*6 + c
    w1 = np.asarray(params["conv1_w"], f32)                         # [6, 1, 5, 5]
    b1 = np.asarray(params["conv1_b"], f32)
    W1 = np.zeros((5, 28, 256), f32)
    B1 = np.zeros((1, 256), f32)
    for ow in range(24):
        pw, par = divmod(ow, 2)
        for c in range(6):
            lane = par * 128 + pw * 6 + c
            B1[0, lane] = b1[c]
            for kh in range(5):
                W1[kh, ow:ow + 5, lane] = w1[c, 0, kh, :]

    # conv2 banded weights: W2[kh, iwp*6+ci, lane], lane = par*128 + pw2*16 + co
    w2 = np.asarray(params["conv2_w"], f32)                         # [16, 6, 5, 5]
    b2 = np.asarray(params["conv2_b"], f32)
    W2 = np.zeros((5, 128, 256), f32)
    B2 = np.zeros((1, 256), f32)
    for ow in range(8):
        pw2, par = divmod(ow, 2)
        for co in range(16):
            lane = par * 128 + pw2 * 16 + co
            B2[0, lane] = b2[co]
            for kh in range(5):
                for kw in range(5):
                    r = (ow + kw) * 6
                    W2[kh, r:r + 6, lane] = w2[co, :, kh, kw]

    # fc1: PyTorch view(-1, 16*4*4) order (C,H,W) folded in; split per pooled row.
    fc1_w = np.asarray(params["fc1_w"], f32).reshape(HIDDEN_DIMS[0], 16, 4, 4)  # [d,c,h,w]
    Wf1 = np.transpose(fc1_w, (2, 3, 1, 0)).reshape(4, 64, HIDDEN_DIMS[0])      # [h, w*16+c, d]
    Wf1p = np.zeros((4, 128, HIDDEN_DIMS[0]), f32)
    Wf1p[:, :64, :] = Wf1
    bf1 = np.asarray(params["fc1_b"], f32).reshape(1, HIDDEN_DIMS[0])

    wf2 = np.asarray(params["fc2_w"], f32).T                        # [64, 32]
    bf2 = np.asarray(params["fc2_b"], f32).reshape(1, HIDDEN_DIMS[1])

    # fc3 padded to 128 lanes so the final store is unmasked / lane-dense.
    wf3 = np.zeros((HIDDEN_DIMS[1], LANE), f32)
    wf3[:, :NUM_CLASSES] = np.asarray(params["fc3_w"], f32).T
    bf3 = np.zeros((1, LANE), f32)
    bf3[0, :NUM_CLASSES] = np.asarray(params["fc3_b"], f32)

    return (jnp.asarray(W1, jnp.float32), jnp.asarray(B1, jnp.float32),
            jnp.asarray(W2, jnp.bfloat16), jnp.asarray(B2, jnp.float32),
            jnp.asarray(Wf1p, jnp.bfloat16), jnp.asarray(bf1, jnp.float32),
            jnp.asarray(wf2, jnp.bfloat16), jnp.asarray(bf2, jnp.float32),
            jnp.asarray(wf3, jnp.bfloat16), jnp.asarray(bf3, jnp.float32))


def _rep_spec(arr):
    nd = arr.ndim
    return pl.BlockSpec(arr.shape, lambda i, _nd=nd: (0,) * _nd)


@jax.jit
def _forward_packed(x, *packed):
    B = x.shape[0]
    BB = min(B, BB_MAX)           # for B >= 256 this gives >= 2 steps -> both v7x TCs busy
    grid = (pl.cdiv(B, BB),)

    in_specs = [pl.BlockSpec((BB, 28, 28), lambda i: (i, 0, 0))]
    in_specs += [_rep_spec(p) for p in packed]

    out = pl.pallas_call(
        mnist_fused_kernel,
        out_shape=jax.ShapeDtypeStruct((B, LANE), jnp.float32),
        grid=grid,
        in_specs=in_specs,
        out_specs=pl.BlockSpec((BB, LANE), lambda i: (i, 0)),
        compiler_params=pltpu.CompilerParams(
            dimension_semantics=("parallel",),          # v7x: split batch over 2 TCs
            vmem_limit_bytes=48 * 1024 * 1024),         # headroom below v7x's 64 MiB
    )(x, *packed)
    return out[:, :NUM_CLASSES]


def mnist_forward(x_nchw, params):
    B = x_nchw.shape[0]
    # NCHW with C == 1: going to [B, 28, 28] is a pure (free) reshape, no transpose.
    x = x_nchw.reshape(B, 28, 28).astype(jnp.float32)
    packed = _pack_params(params)                       # eager numpy packing
    return _forward_packed(x, *packed)


# ----------------------------------------------------------------------------
# Pure-JAX reference (for correctness check)
# ----------------------------------------------------------------------------
def reference_forward(x_nchw, params):
    def conv(x, w, b):
        y = jax.lax.conv_general_dilated(
            x, w, (1, 1), "VALID", dimension_numbers=("NCHW", "OIHW", "NCHW"))
        return y + b.reshape(1, -1, 1, 1)

    def pool(x):
        return jax.lax.reduce_window(x, -jnp.inf, jax.lax.max,
                                     (1, 1, 2, 2), (1, 1, 2, 2), "VALID")

    h = pool(jax.nn.relu(conv(x_nchw, params["conv1_w"], params["conv1_b"])))
    h = pool(jax.nn.relu(conv(h, params["conv2_w"], params["conv2_b"])))
    h = h.reshape(h.shape[0], -1)
    h = jax.nn.relu(h @ params["fc1_w"].T + params["fc1_b"])
    h = jax.nn.relu(h @ params["fc2_w"].T + params["fc2_b"])
    return h @ params["fc3_w"].T + params["fc3_b"]


# ----------------------------------------------------------------------------
# Deterministic parameter init + driver
# ----------------------------------------------------------------------------
def init_params(key):
    ks = jax.random.split(key, 10)

    def n(k, shape, scale=0.1):
        return (scale * jax.random.normal(k, shape)).astype(jnp.float32)

    return {
        "conv1_w": n(ks[0], (6, 1, 5, 5)),   "conv1_b": n(ks[1], (6,)),
        "conv2_w": n(ks[2], (16, 6, 5, 5)),  "conv2_b": n(ks[3], (16,)),
        "fc1_w":   n(ks[4], (HIDDEN_DIMS[0], 256)), "fc1_b": n(ks[5], (HIDDEN_DIMS[0],)),
        "fc2_w":   n(ks[6], (HIDDEN_DIMS[1], HIDDEN_DIMS[0])), "fc2_b": n(ks[7], (HIDDEN_DIMS[1],)),
        "fc3_w":   n(ks[8], (NUM_CLASSES, HIDDEN_DIMS[1])),    "fc3_b": n(ks[9], (NUM_CLASSES,)),
    }


if __name__ == "__main__":
    root = jax.random.PRNGKey(0)
    k_param, k_data = jax.random.split(root)
    params = init_params(k_param)
    # MNIST-shaped input (28x28, 1 channel is forced by view(-1, 16*4*4)).
    x = jax.random.normal(k_data, (2, 1, 28, 28), jnp.float32)

    out = jax.block_until_ready(mnist_forward(x, params))
    ref = jax.block_until_ready(reference_forward(x, params))

    assert out.shape == (2, NUM_CLASSES), out.shape
    max_err = float(jnp.max(jnp.abs(out - ref)))
    assert max_err < 5e-2, f"mismatch vs reference: max_err={max_err}"
    print("KERNEL_OK")
</pallas_src>

<mosaic_0001>
module attributes {stable_mosaic.version = 11 : i64} {
  func.func @mnist_fused_kernel(%arg0: i32, %arg1: memref<2x28x28xf32, #tpu.memory_space<vmem>>, %arg2: memref<5x28x256xf32, #tpu.memory_space<vmem>>, %arg3: memref<1x256xf32, #tpu.memory_space<vmem>>, %arg4: memref<5x128x256xbf16, #tpu.memory_space<vmem>>, %arg5: memref<1x256xf32, #tpu.memory_space<vmem>>, %arg6: memref<4x128x64xbf16, #tpu.memory_space<vmem>>, %arg7: memref<1x64xf32, #tpu.memory_space<vmem>>, %arg8: memref<64x32xbf16, #tpu.memory_space<vmem>>, %arg9: memref<1x32xf32, #tpu.memory_space<vmem>>, %arg10: memref<32x128xbf16, #tpu.memory_space<vmem>>, %arg11: memref<1x128xf32, #tpu.memory_space<vmem>>, %arg12: memref<2x128xf32, #tpu.memory_space<vmem>>) attributes {dimension_semantics = [#tpu.dimension_semantics<parallel>], iteration_bounds = array<i64: 1>, scalar_prefetch = 0 : i64, scratch_operands = 0 : i64, tpu.core_type = #tpu.core_type<tc>, window_params = [{transform_indices = @transform_0, window_bounds = array<i64: 2, 28, 28>}, {pipeline_mode = #tpu.pipeline_mode<synchronous>, transform_indices = @transform_1, window_bounds = array<i64: 5, 28, 256>}, {pipeline_mode = #tpu.pipeline_mode<synchronous>, transform_indices = @transform_2, window_bounds = array<i64: 1, 256>}, {pipeline_mode = #tpu.pipeline_mode<synchronous>, transform_indices = @transform_3, window_bounds = array<i64: 5, 128, 256>}, {pipeline_mode = #tpu.pipeline_mode<synchronous>, transform_indices = @transform_4, window_bounds = array<i64: 1, 256>}, {pipeline_mode = #tpu.pipeline_mode<synchronous>, transform_indices = @transform_5, window_bounds = array<i64: 4, 128, 64>}, {pipeline_mode = #tpu.pipeline_mode<synchronous>, transform_indices = @transform_6, window_bounds = array<i64: 1, 64>}, {pipeline_mode = #tpu.pipeline_mode<synchronous>, transform_indices = @transform_7, window_bounds = array<i64: 64, 32>}, {pipeline_mode = #tpu.pipeline_mode<synchronous>, transform_indices = @transform_8, window_bounds = array<i64: 1, 32>}, {pipeline_mode = #tpu.pipeline_mode<synchronous>, transform_indices = @transform_9, window_bounds = array<i64: 32, 128>}, {pipeline_mode = #tpu.pipeline_mode<synchronous>, transform_indices = @transform_10, window_bounds = array<i64: 1, 128>}, {transform_indices = @transform_11, window_bounds = array<i64: 2, 128>}]} {
    %c0 = arith.constant 0 : index
    %c0_0 = arith.constant 0 : index
    %c0_1 = arith.constant 0 : index
    %0 = vector.load %arg1[%c0, %c0_0, %c0_1] : memref<2x28x28xf32, #tpu.memory_space<vmem>>, vector<2x28x28xf32>
    %cst = arith.constant 0.000000e+00 : f32
    %1 = vector.broadcast %cst : f32 to vector<48x256xf32>
    %2 = vector.extract_strided_slice %0 {offsets = [0, 0, 0], sizes = [2, 24, 28], strides = [1, 1, 1]} : vector<2x28x28xf32> to vector<2x24x28xf32>
    %3 = vector.shape_cast %2 : vector<2x24x28xf32> to vector<48x28xf32>
    %c0_2 = arith.constant 0 : index
    %c0_3 = arith.constant 0 : index
    %c0_4 = arith.constant 0 : index
    %4 = vector.load %arg2[%c0_2, %c0_3, %c0_4] : memref<5x28x256xf32, #tpu.memory_space<vmem>>, vector<1x28x256xf32>
    %5 = vector.shape_cast %4 : vector<1x28x256xf32> to vector<28x256xf32>
    %cst_5 = arith.constant dense<0.000000e+00> : vector<48x256xf32>
    %6 = tpu.matmul %3, %5, %cst_5 {dimension_numbers = #tpu.dot_dimension_numbers<[1], [0], [0], [1], [0, 0, 1, 1], [], []>} : vector<48x28xf32>, vector<28x256xf32>, vector<48x256xf32> -> vector<48x256xf32>
    %7 = arith.addf %1, %6 : vector<48x256xf32>
    %8 = vector.extract_strided_slice %0 {offsets = [0, 1, 0], sizes = [2, 24, 28], strides = [1, 1, 1]} : vector<2x28x28xf32> to vector<2x24x28xf32>
    %9 = vector.shape_cast %8 : vector<2x24x28xf32> to vector<48x28xf32>
    %c1 = arith.constant 1 : index
    %c0_6 = arith.constant 0 : index
    %c0_7 = arith.constant 0 : index
    %10 = vector.load %arg2[%c1, %c0_6, %c0_7] : memref<5x28x256xf32, #tpu.memory_space<vmem>>, vector<1x28x256xf32>
    %11 = vector.shape_cast %10 : vector<1x28x256xf32> to vector<28x256xf32>
    %cst_8 = arith.constant dense<0.000000e+00> : vector<48x256xf32>
    %12 = tpu.matmul %9, %11, %cst_8 {dimension_numbers = #tpu.dot_dimension_numbers<[1], [0], [0], [1], [0, 0, 1, 1], [], []>} : vector<48x28xf32>, vector<28x256xf32>, vector<48x256xf32> -> vector<48x256xf32>
    %13 = arith.addf %7, %12 : vector<48x256xf32>
    %14 = vector.extract_strided_slice %0 {offsets = [0, 2, 0], sizes = [2, 24, 28], strides = [1, 1, 1]} : vector<2x28x28xf32> to vector<2x24x28xf32>
    %15 = vector.shape_cast %14 : vector<2x24x28xf32> to vector<48x28xf32>
    %c2 = arith.constant 2 : index
    %c0_9 = arith.constant 0 : index
    %c0_10 = arith.constant 0 : index
    %16 = vector.load %arg2[%c2, %c0_9, %c0_10] : memref<5x28x256xf32, #tpu.memory_space<vmem>>, vector<1x28x256xf32>
    %17 = vector.shape_cast %16 : vector<1x28x256xf32> to vector<28x256xf32>
    %cst_11 = arith.constant dense<0.000000e+00> : vector<48x256xf32>
    %18 = tpu.matmul %15, %17, %cst_11 {dimension_numbers = #tpu.dot_dimension_numbers<[1], [0], [0], [1], [0, 0, 1, 1], [], []>} : vector<48x28xf32>, vector<28x256xf32>, vector<48x256xf32> -> vector<48x256xf32>
    %19 = arith.addf %13, %18 : vector<48x256xf32>
    %20 = vector.extract_strided_slice %0 {offsets = [0, 3, 0], sizes = [2, 24, 28], strides = [1, 1, 1]} : vector<2x28x28xf32> to vector<2x24x28xf32>
    %21 = vector.shape_cast %20 : vector<2x24x28xf32> to vector<48x28xf32>
    %c3 = arith.constant 3 : index
    %c0_12 = arith.constant 0 : index
    %c0_13 = arith.constant 0 : index
    %22 = vector.load %arg2[%c3, %c0_12, %c0_13] : memref<5x28x256xf32, #tpu.memory_space<vmem>>, vector<1x28x256xf32>
    %23 = vector.shape_cast %22 : vector<1x28x256xf32> to vector<28x256xf32>
    %cst_14 = arith.constant dense<0.000000e+00> : vector<48x256xf32>
    %24 = tpu.matmul %21, %23, %cst_14 {dimension_numbers = #tpu.dot_dimension_numbers<[1], [0], [0], [1], [0, 0, 1, 1], [], []>} : vector<48x28xf32>, vector<28x256xf32>, vector<48x256xf32> -> vector<48x256xf32>
    %25 = arith.addf %19, %24 : vector<48x256xf32>
    %26 = vector.extract_strided_slice %0 {offsets = [0, 4, 0], sizes = [2, 24, 28], strides = [1, 1, 1]} : vector<2x28x28xf32> to vector<2x24x28xf32>
    %27 = vector.shape_cast %26 : vector<2x24x28xf32> to vector<48x28xf32>
    %c4 = arith.constant 4 : index
    %c0_15 = arith.constant 0 : index
    %c0_16 = arith.constant 0 : index
    %28 = vector.load %arg2[%c4, %c0_15, %c0_16] : memref<5x28x256xf32, #tpu.memory_space<vmem>>, vector<1x28x256xf32>
    %29 = vector.shape_cast %28 : vector<1x28x256xf32> to vector<28x256xf32>
    %cst_17 = arith.constant dense<0.000000e+00> : vector<48x256xf32>
    %30 = tpu.matmul %27, %29, %cst_17 {dimension_numbers = #tpu.dot_dimension_numbers<[1], [0], [0], [1], [0, 0, 1, 1], [], []>} : vector<48x28xf32>, vector<28x256xf32>, vector<48x256xf32> -> vector<48x256xf32>
    %31 = arith.addf %25, %30 : vector<48x256xf32>
    %c0_18 = arith.constant 0 : index
    %c0_19 = arith.constant 0 : index
    %32 = vector.load %arg3[%c0_18, %c0_19] : memref<1x256xf32, #tpu.memory_space<vmem>>, vector<1x256xf32>
    %33 = vector.broadcast %32 : vector<1x256xf32> to vector<48x256xf32>
    %34 = arith.addf %31, %33 : vector<48x256xf32>
    %cst_20 = arith.constant 0.000000e+00 : f32
    %35 = vector.broadcast %cst_20 : f32 to vector<48x256xf32>
    %36 = arith.maximumf %34, %35 : vector<48x256xf32>
    %37 = vector.extract_strided_slice %36 {offsets = [0, 0], sizes = [48, 128], strides = [1, 1]} : vector<48x256xf32> to vector<48x128xf32>
    %38 = vector.extract_strided_slice %36 {offsets = [0, 128], sizes = [48, 128], strides = [1, 1]} : vector<48x256xf32> to vector<48x128xf32>
    %39 = arith.maximumf %37, %38 : vector<48x128xf32>
    %40 = vector.shape_cast %39 : vector<48x128xf32> to vector<2x12x2x128xf32>
    %41 = vector.extract_strided_slice %40 {offsets = [0, 0, 0, 0], sizes = [2, 12, 1, 128], strides = [1, 1, 1, 1]} : vector<2x12x2x128xf32> to vector<2x12x1x128xf32>
    %42 = vector.shape_cast %41 : vector<2x12x1x128xf32> to vector<2x12x128xf32>
    %43 = vector.extract_strided_slice %40 {offsets = [0, 0, 1, 0], sizes = [2, 12, 1, 128], strides = [1, 1, 1, 1]} : vector<2x12x2x128xf32> to vector<2x12x1x128xf32>
    %44 = vector.shape_cast %43 : vector<2x12x1x128xf32> to vector<2x12x128xf32>
    %45 = arith.maximumf %42, %44 : vector<2x12x128xf32>
    %46 = arith.truncf %45 : vector<2x12x128xf32> to vector<2x12x128xbf16>
    %cst_21 = arith.constant 0.000000e+00 : f32
    %47 = vector.broadcast %cst_21 : f32 to vector<16x256xf32>
    %48 = vector.extract_strided_slice %46 {offsets = [0, 0, 0], sizes = [2, 8, 128], strides = [1, 1, 1]} : vector<2x12x128xbf16> to vector<2x8x128xbf16>
    %49 = vector.shape_cast %48 : vector<2x8x128xbf16> to vector<16x128xbf16>
    %c0_22 = arith.constant 0 : index
    %c0_23 = arith.constant 0 : index
    %c0_24 = arith.constant 0 : index
    %50 = vector.load %arg4[%c0_22, %c0_23, %c0_24] : memref<5x128x256xbf16, #tpu.memory_space<vmem>>, vector<1x128x256xbf16>
    %51 = vector.shape_cast %50 : vector<1x128x256xbf16> to vector<128x256xbf16>
    %cst_25 = arith.constant dense<0.000000e+00> : vector<16x256xf32>
    %52 = tpu.matmul %49, %51, %cst_25 {dimension_numbers = #tpu.dot_dimension_numbers<[1], [0], [0], [1], [0, 0, 1, 1], [], []>} : vector<16x128xbf16>, vector<128x256xbf16>, vector<16x256xf32> -> vector<16x256xf32>
    %53 = arith.addf %47, %52 : vector<16x256xf32>
    %54 = vector.extract_strided_slice %46 {offsets = [0, 1, 0], sizes = [2, 8, 128], strides = [1, 1, 1]} : vector<2x12x128xbf16> to vector<2x8x128xbf16>
    %55 = vector.shape_cast %54 : vector<2x8x128xbf16> to vector<16x128xbf16>
    %c1_26 = arith.constant 1 : index
    %c0_27 = arith.constant 0 : index
    %c0_28 = arith.constant 0 : index
    %56 = vector.load %arg4[%c1_26, %c0_27, %c0_28] : memref<5x128x256xbf16, #tpu.memory_space<vmem>>, vector<1x128x256xbf16>
    %57 = vector.shape_cast %56 : vector<1x128x256xbf16> to vector<128x256xbf16>
    %cst_29 = arith.constant dense<0.000000e+00> : vector<16x256xf32>
    %58 = tpu.matmul %55, %57, %cst_29 {dimension_numbers = #tpu.dot_dimension_numbers<[1], [0], [0], [1], [0, 0, 1, 1], [], []>} : vector<16x128xbf16>, vector<128x256xbf16>, vector<16x256xf32> -> vector<16x256xf32>
    %59 = arith.addf %53, %58 : vector<16x256xf32>
    %60 = vector.extract_strided_slice %46 {offsets = [0, 2, 0], sizes = [2, 8, 128], strides = [1, 1, 1]} : vector<2x12x128xbf16> to vector<2x8x128xbf16>
    %61 = vector.shape_cast %60 : vector<2x8x128xbf16> to vector<16x128xbf16>
    %c2_30 = arith.constant 2 : index
    %c0_31 = arith.constant 0 : index
    %c0_32 = arith.constant 0 : index
    %62 = vector.load %arg4[%c2_30, %c0_31, %c0_32] : memref<5x128x256xbf16, #tpu.memory_space<vmem>>, vector<1x128x256xbf16>
    %63 = vector.shape_cast %62 : vector<1x128x256xbf16> to vector<128x256xbf16>
    %cst_33 = arith.constant dense<0.000000e+00> : vector<16x256xf32>
    %64 = tpu.matmul %61, %63, %cst_33 {dimension_numbers = #tpu.dot_dimension_numbers<[1], [0], [0], [1], [0, 0, 1, 1], [], []>} : vector<16x128xbf16>, vector<128x256xbf16>, vector<16x256xf32> -> vector<16x256xf32>
    %65 = arith.addf %59, %64 : vector<16x256xf32>
    %66 = vector.extract_strided_slice %46 {offsets = [0, 3, 0], sizes = [2, 8, 128], strides = [1, 1, 1]} : vector<2x12x128xbf16> to vector<2x8x128xbf16>
    %67 = vector.shape_cast %66 : vector<2x8x128xbf16> to vector<16x128xbf16>
    %c3_34 = arith.constant 3 : index
    %c0_35 = arith.constant 0 : index
    %c0_36 = arith.constant 0 : index
    %68 = vector.load %arg4[%c3_34, %c0_35, %c0_36] : memref<5x128x256xbf16, #tpu.memory_space<vmem>>, vector<1x128x256xbf16>
    %69 = vector.shape_cast %68 : vector<1x128x256xbf16> to vector<128x256xbf16>
    %cst_37 = arith.constant dense<0.000000e+00> : vector<16x256xf32>
    %70 = tpu.matmul %67, %69, %cst_37 {dimension_numbers = #tpu.dot_dimension_numbers<[1], [0], [0], [1], [0, 0, 1, 1], [], []>} : vector<16x128xbf16>, vector<128x256xbf16>, vector<16x256xf32> -> vector<16x256xf32>
    %71 = arith.addf %65, %70 : vector<16x256xf32>
    %72 = vector.extract_strided_slice %46 {offsets = [0, 4, 0], sizes = [2, 8, 128], strides = [1, 1, 1]} : vector<2x12x128xbf16> to vector<2x8x128xbf16>
    %73 = vector.shape_cast %72 : vector<2x8x128xbf16> to vector<16x128xbf16>
    %c4_38 = arith.constant 4 : index
    %c0_39 = arith.constant 0 : index
    %c0_40 = arith.constant 0 : index
    %74 = vector.load %arg4[%c4_38, %c0_39, %c0_40] : memref<5x128x256xbf16, #tpu.memory_space<vmem>>, vector<1x128x256xbf16>
    %75 = vector.shape_cast %74 : vector<1x128x256xbf16> to vector<128x256xbf16>
    %cst_41 = arith.constant dense<0.000000e+00> : vector<16x256xf32>
    %76 = tpu.matmul %73, %75, %cst_41 {dimension_numbers = #tpu.dot_dimension_numbers<[1], [0], [0], [1], [0, 0, 1, 1], [], []>} : vector<16x128xbf16>, vector<128x256xbf16>, vector<16x256xf32> -> vector<16x256xf32>
    %77 = arith.addf %71, %76 : vector<16x256xf32>
    %c0_42 = arith.constant 0 : index
    %c0_43 = arith.constant 0 : index
    %78 = vector.load %arg5[%c0_42, %c0_43] : memref<1x256xf32, #tpu.memory_space<vmem>>, vector<1x256xf32>
    %79 = vector.broadcast %78 : vector<1x256xf32> to vector<16x256xf32>
    %80 = arith.addf %77, %79 : vector<16x256xf32>
    %cst_44 = arith.constant 0.000000e+00 : f32
    %81 = vector.broadcast %cst_44 : f32 to vector<16x256xf32>
    %82 = arith.maximumf %80, %81 : vector<16x256xf32>
    %83 = vector.extract_strided_slice %82 {offsets = [0, 0], sizes = [16, 128], strides = [1, 1]} : vector<16x256xf32> to vector<16x128xf32>
    %84 = vector.extract_strided_slice %82 {offsets = [0, 128], sizes = [16, 128], strides = [1, 1]} : vector<16x256xf32> to vector<16x128xf32>
    %85 = arith.maximumf %83, %84 : vector<16x128xf32>
    %86 = vector.shape_cast %85 : vector<16x128xf32> to vector<2x4x2x128xf32>
    %87 = vector.extract_strided_slice %86 {offsets = [0, 0, 0, 0], sizes = [2, 4, 1, 128], strides = [1, 1, 1, 1]} : vector<2x4x2x128xf32> to vector<2x4x1x128xf32>
    %88 = vector.shape_cast %87 : vector<2x4x1x128xf32> to vector<2x4x128xf32>
    %89 = vector.extract_strided_slice %86 {offsets = [0, 0, 1, 0], sizes = [2, 4, 1, 128], strides = [1, 1, 1, 1]} : vector<2x4x2x128xf32> to vector<2x4x1x128xf32>
    %90 = vector.shape_cast %89 : vector<2x4x1x128xf32> to vector<2x4x128xf32>
    %91 = arith.maximumf %88, %90 : vector<2x4x128xf32>
    %92 = arith.truncf %91 : vector<2x4x128xf32> to vector<2x4x128xbf16>
    %cst_45 = arith.constant 0.000000e+00 : f32
    %93 = vector.broadcast %cst_45 : f32 to vector<2x64xf32>
    %94 = vector.extract_strided_slice %92 {offsets = [0, 0, 0], sizes = [2, 1, 128], strides = [1, 1, 1]} : vector<2x4x128xbf16> to vector<2x1x128xbf16>
    %95 = vector.shape_cast %94 : vector<2x1x128xbf16> to vector<2x128xbf16>
    %c0_46 = arith.constant 0 : index
    %c0_47 = arith.constant 0 : index
    %c0_48 = arith.constant 0 : index
    %96 = vector.load %arg6[%c0_46, %c0_47, %c0_48] : memref<4x128x64xbf16, #tpu.memory_space<vmem>>, vector<1x128x64xbf16>
    %97 = vector.shape_cast %96 : vector<1x128x64xbf16> to vector<128x64xbf16>
    %cst_49 = arith.constant dense<0.000000e+00> : vector<2x64xf32>
    %98 = tpu.matmul %95, %97, %cst_49 {dimension_numbers = #tpu.dot_dimension_numbers<[1], [0], [0], [1], [0, 0, 1, 1], [], []>} : vector<2x128xbf16>, vector<128x64xbf16>, vector<2x64xf32> -> vector<2x64xf32>
    %99 = arith.addf %93, %98 : vector<2x64xf32>
    %100 = vector.extract_strided_slice %92 {offsets = [0, 1, 0], sizes = [2, 1, 128], strides = [1, 1, 1]} : vector<2x4x128xbf16> to vector<2x1x128xbf16>
    %101 = vector.shape_cast %100 : vector<2x1x128xbf16> to vector<2x128xbf16>
    %c1_50 = arith.constant 1 : index
    %c0_51 = arith.constant 0 : index
    %c0_52 = arith.constant 0 : index
    %102 = vector.load %arg6[%c1_50, %c0_51, %c0_52] : memref<4x128x64xbf16, #tpu.memory_space<vmem>>, vector<1x128x64xbf16>
    %103 = vector.shape_cast %102 : vector<1x128x64xbf16> to vector<128x64xbf16>
    %cst_53 = arith.constant dense<0.000000e+00> : vector<2x64xf32>
    %104 = tpu.matmul %101, %103, %cst_53 {dimension_numbers = #tpu.dot_dimension_numbers<[1], [0], [0], [1], [0, 0, 1, 1], [], []>} : vector<2x128xbf16>, vector<128x64xbf16>, vector<2x64xf32> -> vector<2x64xf32>
    %105 = arith.addf %99, %104 : vector<2x64xf32>
    %106 = vector.extract_strided_slice %92 {offsets = [0, 2, 0], sizes = [2, 1, 128], strides = [1, 1, 1]} : vector<2x4x128xbf16> to vector<2x1x128xbf16>
    %107 = vector.shape_cast %106 : vector<2x1x128xbf16> to vector<2x128xbf16>
    %c2_54 = arith.constant 2 : index
    %c0_55 = arith.constant 0 : index
    %c0_56 = arith.constant 0 : index
    %108 = vector.load %arg6[%c2_54, %c0_55, %c0_56] : memref<4x128x64xbf16, #tpu.memory_space<vmem>>, vector<1x128x64xbf16>
    %109 = vector.shape_cast %108 : vector<1x128x64xbf16> to vector<128x64xbf16>
    %cst_57 = arith.constant dense<0.000000e+00> : vector<2x64xf32>
    %110 = tpu.matmul %107, %109, %cst_57 {dimension_numbers = #tpu.dot_dimension_numbers<[1], [0], [0], [1], [0, 0, 1, 1], [], []>} : vector<2x128xbf16>, vector<128x64xbf16>, vector<2x64xf32> -> vector<2x64xf32>
    %111 = arith.addf %105, %110 : vector<2x64xf32>
    %112 = vector.extract_strided_slice %92 {offsets = [0, 3, 0], sizes = [2, 1, 128], strides = [1, 1, 1]} : vector<2x4x128xbf16> to vector<2x1x128xbf16>
    %113 = vector.shape_cast %112 : vector<2x1x128xbf16> to vector<2x128xbf16>
    %c3_58 = arith.constant 3 : index
    %c0_59 = arith.constant 0 : index
    %c0_60 = arith.constant 0 : index
    %114 = vector.load %arg6[%c3_58, %c0_59, %c0_60] : memref<4x128x64xbf16, #tpu.memory_space<vmem>>, vector<1x128x64xbf16>
    %115 = vector.shape_cast %114 : vector<1x128x64xbf16> to vector<128x64xbf16>
    %cst_61 = arith.constant dense<0.000000e+00> : vector<2x64xf32>
    %116 = tpu.matmul %113, %115, %cst_61 {dimension_numbers = #tpu.dot_dimension_numbers<[1], [0], [0], [1], [0, 0, 1, 1], [], []>} : vector<2x128xbf16>, vector<128x64xbf16>, vector<2x64xf32> -> vector<2x64xf32>
    %117 = arith.addf %111, %116 : vector<2x64xf32>
    %c0_62 = arith.constant 0 : index
    %c0_63 = arith.constant 0 : index
    %118 = vector.load %arg7[%c0_62, %c0_63] : memref<1x64xf32, #tpu.memory_space<vmem>>, vector<1x64xf32>
    %119 = vector.broadcast %118 : vector<1x64xf32> to vector<2x64xf32>
    %120 = arith.addf %117, %119 : vector<2x64xf32>
    %cst_64 = arith.constant 0.000000e+00 : f32
    %121 = vector.broadcast %cst_64 : f32 to vector<2x64xf32>
    %122 = arith.maximumf %120, %121 : vector<2x64xf32>
    %123 = arith.truncf %122 : vector<2x64xf32> to vector<2x64xbf16>
    %c0_65 = arith.constant 0 : index
    %c0_66 = arith.constant 0 : index
    %124 = vector.load %arg8[%c0_65, %c0_66] : memref<64x32xbf16, #tpu.memory_space<vmem>>, vector<64x32xbf16>
    %cst_67 = arith.constant dense<0.000000e+00> : vector<2x32xf32>
    %125 = tpu.matmul %123, %124, %cst_67 {dimension_numbers = #tpu.dot_dimension_numbers<[1], [0], [0], [1], [0, 0, 1, 1], [], []>} : vector<2x64xbf16>, vector<64x32xbf16>, vector<2x32xf32> -> vector<2x32xf32>
    %c0_68 = arith.constant 0 : index
    %c0_69 = arith.constant 0 : index
    %126 = vector.load %arg9[%c0_68, %c0_69] : memref<1x32xf32, #tpu.memory_space<vmem>>, vector<1x32xf32>
    %127 = vector.broadcast %126 : vector<1x32xf32> to vector<2x32xf32>
    %128 = arith.addf %125, %127 : vector<2x32xf32>
    %cst_70 = arith.constant 0.000000e+00 : f32
    %129 = vector.broadcast %cst_70 : f32 to vector<2x32xf32>
    %130 = arith.maximumf %128, %129 : vector<2x32xf32>
    %131 = arith.truncf %130 : vector<2x32xf32> to vector<2x32xbf16>
    %c0_71 = arith.constant 0 : index
    %c0_72 = arith.constant 0 : index
    %132 = vector.load %arg10[%c0_71, %c0_72] : memref<32x128xbf16, #tpu.memory_space<vmem>>, vector<32x128xbf16>
    %cst_73 = arith.constant dense<0.000000e+00> : vector<2x128xf32>
    %133 = tpu.matmul %131, %132, %cst_73 {dimension_numbers = #tpu.dot_dimension_numbers<[1], [0], [0], [1], [0, 0, 1, 1], [], []>} : vector<2x32xbf16>, vector<32x128xbf16>, vector<2x128xf32> -> vector<2x128xf32>
    %c0_74 = arith.constant 0 : index
    %c0_75 = arith.constant 0 : index
    %134 = vector.load %arg11[%c0_74, %c0_75] : memref<1x128xf32, #tpu.memory_space<vmem>>, vector<1x128xf32>
    %135 = vector.broadcast %134 : vector<1x128xf32> to vector<2x128xf32>
    %136 = arith.addf %133, %135 : vector<2x128xf32>
    %c0_76 = arith.constant 0 : index
    %c0_77 = arith.constant 0 : index
    %137 = vector.load %arg12[%c0_76, %c0_77] : memref<2x128xf32, #tpu.memory_space<vmem>>, vector<2x128xf32>
    tpu.vector_store %arg12[%c0_76, %c0_77], %136 {strides = array<i32>} : memref<2x128xf32, #tpu.memory_space<vmem>>, vector<2x128xf32>,
    return
  }
  func.func @transform_0(%arg0: i32) -> (i32, i32, i32) {
    %c0_i32 = arith.constant 0 : i32
    %c0_i32_0 = arith.constant 0 : i32
    %c0_i32_1 = arith.constant 0 : i32
    return %arg0, %c0_i32, %c0_i32_0 : i32, i32, i32
  }
  func.func @transform_1(%arg0: i32) -> (i32, i32, i32) {
    %c0_i32 = arith.constant 0 : i32
    %c0_i32_0 = arith.constant 0 : i32
    %c0_i32_1 = arith.constant 0 : i32
    %c0_i32_2 = arith.constant 0 : i32
    return %c0_i32, %c0_i32_0, %c0_i32_1 : i32, i32, i32
  }
  func.func @transform_2(%arg0: i32) -> (i32, i32) {
    %c0_i32 = arith.constant 0 : i32
    %c0_i32_0 = arith.constant 0 : i32
    %c0_i32_1 = arith.constant 0 : i32
    return %c0_i32, %c0_i32_0 : i32, i32
  }
  func.func @transform_3(%arg0: i32) -> (i32, i32, i32) {
    %c0_i32 = arith.constant 0 : i32
    %c0_i32_0 = arith.constant 0 : i32
    %c0_i32_1 = arith.constant 0 : i32
    %c0_i32_2 = arith.constant 0 : i32
    return %c0_i32, %c0_i32_0, %c0_i32_1 : i32, i32, i32
  }
  func.func @transform_4(%arg0: i32) -> (i32, i32) {
    %c0_i32 = arith.constant 0 : i32
    %c0_i32_0 = arith.constant 0 : i32
    %c0_i32_1 = arith.constant 0 : i32
    return %c0_i32, %c0_i32_0 : i32, i32
  }
  func.func @transform_5(%arg0: i32) -> (i32, i32, i32) {
    %c0_i32 = arith.constant 0 : i32
    %c0_i32_0 = arith.constant 0 : i32
    %c0_i32_1 = arith.constant 0 : i32
    %c0_i32_2 = arith.constant 0 : i32
    return %c0_i32, %c0_i32_0, %c0_i32_1 : i32, i32, i32
  }
  func.func @transform_6(%arg0: i32) -> (i32, i32) {
    %c0_i32 = arith.constant 0 : i32
    %c0_i32_0 = arith.constant 0 : i32
    %c0_i32_1 = arith.constant 0 : i32
    return %c0_i32, %c0_i32_0 : i32, i32
  }
  func.func @transform_7(%arg0: i32) -> (i32, i32) {
    %c0_i32 = arith.constant 0 : i32
    %c0_i32_0 = arith.constant 0 : i32
    %c0_i32_1 = arith.constant 0 : i32
    return %c0_i32, %c0_i32_0 : i32, i32
  }
  func.func @transform_8(%arg0: i32) -> (i32, i32) {
    %c0_i32 = arith.constant 0 : i32
    %c0_i32_0 = arith.constant 0 : i32
    %c0_i32_1 = arith.constant 0 : i32
    return %c0_i32, %c0_i32_0 : i32, i32
  }
  func.func @transform_9(%arg0: i32) -> (i32, i32) {
    %c0_i32 = arith.constant 0 : i32
    %c0_i32_0 = arith.constant 0 : i32
    %c0_i32_1 = arith.constant 0 : i32
    return %c0_i32, %c0_i32_0 : i32, i32
  }
  func.func @transform_10(%arg0: i32) -> (i32, i32) {
    %c0_i32 = arith.constant 0 : i32
    %c0_i32_0 = arith.constant 0 : i32
    %c0_i32_1 = arith.constant 0 : i32
    return %c0_i32, %c0_i32_0 : i32, i32
  }
  func.func @transform_11(%arg0: i32) -> (i32, i32) {
    %c0_i32 = arith.constant 0 : i32
    %c0_i32_0 = arith.constant 0 : i32
    return %arg0, %c0_i32 : i32, i32
  }
}

</mosaic_0001>

<bundles_post_ra>
// kernel: _forward_packed.1
= control target key start
LH: loop header
LB: loop body
LE: loop exit
PB: predicated region body
PF: predicated region fallthrough
CT: control target
= control target key end

     0   :  { %16 = vsyncpa [#allocation3], 0  ;;  %s4421_s0 = inlined_call_operand.vmem [shape: f32[2,28,28], index: 0, kind: input, shape index: {}]   ;;  %s4422_s1 = inlined_call_operand.vmem [shape: f32[5,28,256], index: 1, kind: input, shape index: {}]   ;;  %s4423_s2 = inlined_call_operand.vmem [shape: f32[1,256], index: 2, kind: input, shape index: {}]   ;;  %s4424_s3 = inlined_call_operand.hbm [shape: bf16[5,128,256], index: 3, kind: input, shape index: {}]   ;;  %s4425_s4 = inlined_call_operand.vmem [shape: f32[1,256], index: 4, kind: input, shape index: {}]   ;;  %s4426_s5 = inlined_call_operand.vmem [shape: bf16[4,128,64], index: 5, kind: input, shape index: {}]   ;;  %s4427_s6 = inlined_call_operand.vmem [shape: f32[1,64], index: 6, kind: input, shape index: {}]   ;;  %s4428_s7 = inlined_call_operand.vmem [shape: bf16[64,32], index: 7, kind: input, shape index: {}]   ;;  %s4429_s8 = inlined_call_operand.vmem [shape: f32[1,32], index: 8, kind: input, shape index: {}]   ;;  %s4430_s9 = inlined_call_operand.vmem [shape: bf16[32,128], index: 9, kind: input, shape index: {}]   ;;  %s4431_s10 = inlined_call_operand.vmem [shape: f32[1,128], index: 10, kind: input, shape index: {}]   ;;  %s4432_s11 = inlined_call_operand.hbm [shape: f32[2,128], index: 11, kind: output, shape index: {}]  }
   0x1   :  { %17 = vsyncpa [#allocation4], 0  ;;  %s3501_s17 = smov [#allocation2]   ;;  %s3453_s21 = scalar_lea.hbm %s4424_s3, 10240 }
   0x2   :  { %s29_s18 = sshll.u32 %s3501_s17, 4  ;;  %p3454_p0 = scmp.ne.s32.totalorder %s4424_s3, %s3453_s21  ;;  %s30_s18 = int_to_ptr.vmem [resolvable:$true] %s29_s18 }
   0x3   :  { %p3457_p1 = scmp.lt.u32.totalorder %s3453_s21, %s4424_s3 }
   0x5   :  { %p3459_p2 = pnand %p3457_p1, %p3454_p0 }
   0x7   :  { %3462 = shalt.err (!%p3459_p2)
}
   0x8   :  { %s3463_s26 = scalar_lea.vmem %s30_s18, 10240  ;;  %p3468_p4 = scmp.lt.s32.totalorder %s30_s18, %s30_s18 }
   0x9   :  { %p3464_p3 = scmp.ne.s32.totalorder %s30_s18, %s3463_s26  ;;  %p3469_p5 = scmp.lt.s32.totalorder %s3463_s26, %s3463_s26 }
   0xb   :  { %p3470_p6 = por %p3469_p5, %p3468_p4 }
   0xd   :  { %p3471_p7 = pnand %p3470_p6, %p3464_p3 }
   0xf   :  { %3474 = shalt.err (!%p3471_p7)
}
  0x10   :  { %s3502_s27 = smov 128   ;;  %s3503_s28 = smov 8  }
  0x11   :  { %35 = dma.hbm_to_vmem [thread:$0]  %s4424_s3, 10240, %s30_s18, [#allocation3], %s3502_s27, %s3502_s27, %s3503_s28  }
  0x12   :  { %3497 = dma.done.wait [#allocation3], 10240  }
  0x13   :  { %3498 = vsyncadd [#allocation3], 4294957056  ;;  %v3504_v0 = vmov 0.0   ;;  %vm115_vm0 = vcmask 1043456   ;;  %vm3505_vm1 = vmmov 1   ;;  %v2754_v2 = vld [vmem:[%s4422_s1 + $0x48] sm:$0xff] }
  0x14   :  { %186 = vmatprep.mubr.f32.mxu0 %v3504_v0  ;;  %vm3584_vm2 = vmpackc.low %vm115_vm0, %vm3505_vm1  ;;  %v2756_v3 = vld [vmem:[%s4422_s1 + $0x58] sm:$0xff]  ;;  %v2753_v4 = vld [vmem:[%s4422_s1 + $0x40] sm:$0xff]  ;;  %vm78_vm3 = vcmask 1046528   ;;  %vm497_vm4 = vcmask 1044480   ;;  %vm102_vm5 = vcmask 228352   ;;  %vm342_vm6 = vcmask 1045504  }
  0x15   :  { %v3172_v5 = vpack.c.bf16 %v2756_v3, %v2754_v2  ;;  %v2755_v6 = vld [vmem:[%s4422_s1 + $0x50] sm:$0xff]  ;;  %v2758_v7 = vld [vmem:[%s4422_s1 + $0x68] sm:$0xff]  ;;  %v2760_v8 = vld [vmem:[%s4422_s1 + $0x78] sm:$0xf]  ;;  %vm1166_vm7 = vcmask 1041409   ;;  %vm1169_vm8 = vcmask 1042434  }
  0x16   :  { %v3174_v9 = vpack.c.bf16 %v2755_v6, %v2753_v4  ;;  %v3176_v10 = vpack.c.bf16 %v2760_v8, %v2758_v7  ;;  %v2757_v11 = vld [vmem:[%s4422_s1 + $0x60] sm:$0xff]  ;;  %v2759_v12 = vld [vmem:[%s4422_s1 + $0x70] sm:$0xf]  ;;  %v3620_v14 = vld [vmem:[%s4421_s0 + $0x8] sm:$0xff]  ;;  %vm1172_vm9 = vcmask 1043459   ;;  %vm1175_vm10 = vcmask 1044484  }
  0x17   :  { %v3615_v13 = vld [vmem:[%s4421_s0] sm:$0xff]  ;;  %3173 = vmatprep.subr.bf16.mxu0 %v3172_v5  ;;  %v63_v15 = vld [vmem:[%s4422_s1 + $0x8] sm:$0xff]  ;;  %v65_v16 = vld [vmem:[%s4422_s1 + $0x18] sm:$0xff]  ;;  %v3179_v17 = vpack.c.bf16 %v2759_v12, %v2757_v11  ;;  %v80_v19 = vrot.slane %v3620_v14, 1  ;;  %v499_v27 = vrot.slane %v3620_v14, 3  ;;  %v653_v59 = vrot.slane %v3620_v14, 4 }
  0x18   :  { %3175 = vmatpush1.bf16.msra.mxu0 %v3174_v9  ;;  %v79_v18 = vrot.slane %v3615_v13, 1  ;;  %v3182_v20 = vpack.c.bf16 %v65_v16, %v63_v15  ;;  %v62_v21 = vld [vmem:[%s4422_s1] sm:$0xff]  ;;  %v64_v22 = vld [vmem:[%s4422_s1 + $0x10] sm:$0xff]  ;;  %v67_v24 = vld [vmem:[%s4422_s1 + $0x28] sm:$0xff]  ;;  %v498_v26 = vrot.slane %v3615_v13, 3  ;;  %v652_v58 = vrot.slane %v3615_v13, 4 }
  0x19   :  { %3178 = vmatprep.subr.msk.bf16.mxu0 %vm3584_vm2, %v3176_v10  ;;  %v3641_v23 = vld [vmem:[%s4421_s0 + $0x10] sm:$0xff]  ;;  %v69_v25 = vld [vmem:[%s4422_s1 + $0x38] sm:$0xf]  ;;  %v3184_v29 = vpack.c.bf16 %v64_v22, %v62_v21  ;;  %v3663_v32 = vld [vmem:[%s4421_s0 + $0x20] sm:$0xff]  ;;  %vm1178_vm11 = vcmask 1045509   ;;  %vm1181_vm12 = vcmask 1046534  }
  0x1a   :  { %v81_v28 = vsel %vm78_vm3, %v79_v18, %v80_v19  ;;  %v82_v30 = vrot.slane %v3641_v23, 1  ;;  %v3658_v31 = vld [vmem:[%s4421_s0 + $0x18] sm:$0xf]  ;;  %v3186_v33 = vpack.c.bf16 %v69_v25, %v67_v24  ;;  %v66_v34 = vld [vmem:[%s4422_s1 + $0x20] sm:$0xff]  ;;  %v68_v35 = vld [vmem:[%s4422_s1 + $0x30] sm:$0xf]  ;;  %v3683_v39 = vsel %vm497_vm4, %v498_v26, %v499_v27 }
  0x1b   :  { %v3674_v36 = vld [vmem:[%s4421_s0 + $0x28] sm:$0xff]  ;;  %v2780_v38 = vld [vmem:[%s4422_s1 + $0x98] sm:$0xff]  ;;  %v84_v41 = vrot.slane %v3658_v31, 1  ;;  %v86_v42 = vrot.slane %v3663_v32, 1  ;;  %v3189_v43 = vpack.c.bf16 %v68_v35, %v66_v34  ;;  %v501_v46 = vrot.slane %v3641_v23, 3  ;;  %v3700_v49 = vld [vmem:[%s4421_s0 + $0x30] sm:$0xff] }
  0x1c   :  { %3181 = vmatpush1.bf16.msk.msra.mxu0 %vm3584_vm2, %v3179_v17  ;;  %v2778_v37 = vld [vmem:[%s4422_s1 + $0x88] sm:$0xff]  ;;  %v83_v40 = vsel %vm78_vm3, %v80_v19, %v82_v30  ;;  %v87_v44 = vrot.slane %v3674_v36, 1  ;;  %v503_v47 = vrot.slane %v3658_v31, 3  ;;  %v505_v48 = vrot.slane %v3663_v32, 3  ;;  %v3705_v50 = vld [vmem:[%s4421_s0 + $0x38] sm:$0xf] }
  0x1d   :  { %3183 = vmatprep.subr.bf16.mxu0 %v3182_v20  ;;  %v3192_v45 = vpack.c.bf16 %v2780_v38, %v2778_v37  ;;  %v3708_v51 = vsel %vm497_vm4, %v499_v27, %v501_v46  ;;  %v85_v53 = vsel %vm78_vm3, %v82_v30, %v84_v41  ;;  %v506_v54 = vrot.slane %v3674_v36, 3  ;;  %v2777_v18 = vld [vmem:[%s4422_s1 + $0x80] sm:$0xff]  ;;  %v2779_v19 = vld [vmem:[%s4422_s1 + $0x90] sm:$0xff]  ;;  %v2782_v21 = vld [vmem:[%s4422_s1 + $0xa8] sm:$0xff] }
  0x1e   :  { %v3711_v52 = vsel %vm497_vm4, %v501_v46, %v503_v47  ;;  %v508_v55 = vrot.slane %v3700_v49, 3  ;;  %v510_v56 = vrot.slane %v3705_v50, 3  ;;  %v88_v57 = vsel %vm78_vm3, %v86_v42, %v87_v44  ;;  %v2784_v22 = vld [vmem:[%s4422_s1 + $0xb8] sm:$0xf]  ;;  %v2781_v24 = vld [vmem:[%s4422_s1 + $0xa0] sm:$0xff]  ;;  %v2794_v27 = vld [vmem:[%s4422_s1 + $0xc8] sm:$0xff] }
  0x1f   :  { %2763 = vmatmul.mubr.msk.f32.vlgmr.msra.gmra.mrb[0].mxu0 %vm102_vm5, %v81_v28  ;;  %v655_v60 = vrot.slane %v3641_v23, 4  ;;  %v3725_v61 = vsel %vm497_vm4, %v505_v48, %v506_v54  ;;  %v657_v2 = vrot.slane %v3658_v31, 4  ;;  %v3736_v3 = vsel %vm115_vm0, %v652_v58, %v653_v59  ;;  %v2783_v25 = vld [vmem:[%s4422_s1 + $0xb0] sm:$0xf]  ;;  %v2796_v28 = vld [vmem:[%s4422_s1 + $0xd8] sm:$0xff] }
  0x20   :  { %3185 = vmatpush1.bf16.msra.mxu0 %v3184_v29  ;;  %192 = vmatprep.mubr.f32.mxu0 %v3504_v0  ;;  %v3728_v62 = vsel %vm497_vm4, %v506_v54, %v508_v55  ;;  %v3731_v63 = vsel %vm497_vm4, %v508_v55, %v510_v56  ;;  %v659_v5 = vrot.slane %v3663_v32, 4  ;;  %v660_v6 = vrot.slane %v3674_v36, 4  ;;  %v3295_v1 = vld [vmem:[#allocation2 + $0x84] ss:$8 sps:$4 sm:$0xff]  }
  0x21   :  { %3188 = vmatprep.subr.msk.bf16.mxu0 %vm3584_vm2, %v3186_v33  ;;  %v3739_v4 = vsel %vm115_vm0, %v653_v59, %v655_v60  ;;  %v89_v7 = vrot.slane %v3700_v49, 1  ;;  %v3746_v8 = vsel %vm115_vm0, %v655_v60, %v657_v2  ;;  %v662_v9 = vrot.slane %v3700_v49, 4  ;;  %v2809_v60 = vld [vmem:[%s4422_s1 + $0x100] sm:$0xff]  ;;  %v2814_v2 = vld [vmem:[%s4422_s1 + $0x128] sm:$0xff]  ;;  %1282 = vmatprep.subr.bf16.mxu1 %v3295_v1 }
  0x22   :  { %v664_v10 = vrot.slane %v3705_v50, 4  ;;  %v3751_v11 = vsel %vm115_vm0, %v659_v5, %v660_v6  ;;  %v91_v17 = vrot.slane %v3705_v50, 1  ;;  %v3194_v26 = vpack.c.bf16 %v2779_v19, %v2777_v18  ;;  %v3318_v18 = vld [vmem:[#allocation2 + $0xf0] ss:$8 sps:$4 sm:$0xff]   ;;  %v3321_v19 = vld [vmem:[#allocation2 + $0x4] ss:$8 sps:$4 sm:$0xff]  }
  0x23   :  { %2764 = vmatmul.mubr.msk.f32.gmra.mrb[2].mxu0 %vm102_vm5, %v83_v40  ;;  %v3754_v12 = vsel %vm115_vm0, %v660_v6, %v662_v9  ;;  %v90_v16 = vsel %vm78_vm3, %v87_v44, %v89_v7  ;;  %v3196_v29 = vpack.c.bf16 %v2784_v22, %v2782_v21  ;;  %v3199_v30 = vpack.c.bf16 %v2783_v25, %v2781_v24  ;;  %v2810_v44 = vld [vmem:[%s4422_s1 + $0x108] sm:$0xff]  ;;  %v806_v25 = vld [vmem:[%s4423_s2] sm:$0x3] }
  0x24   :  { %198 = vmatprep.mubr.f32.mxu0 %v3504_v0  ;;  %3191 = vmatpush1.bf16.msk.msra.mxu0 %vm3584_vm2, %v3189_v43  ;;  %v3757_v15 = vsel %vm115_vm0, %v662_v9, %v664_v10  ;;  %v92_v20 = vsel %vm78_vm3, %v89_v7, %v91_v17  ;;  %v3202_v33 = vpack.c.bf16 %v2796_v28, %v2794_v27  ;;  %v343_v34 = vrot.slane %v3615_v13, 2  ;;  %v2813_v7 = vld [vmem:[%s4422_s1 + $0x120] sm:$0xff]  ;;  %v2815_v9 = vld [vmem:[%s4422_s1 + $0x130] sm:$0xf]  ;;  %v3316_v17 = vld [vmem:[#allocation2 + $0xf4] ss:$8 sps:$4 sm:$0xff]  }
  0x25   :  { %3193 = vmatprep.subr.bf16.mxu0 %v3192_v45  ;;  %v344_v35 = vrot.slane %v3620_v14, 2  ;;  %v346_v37 = vrot.slane %v3641_v23, 2  ;;  %v348_v38 = vrot.slane %v3658_v31, 2  ;;  %v350_v40 = vrot.slane %v3663_v32, 2  ;;  %v2800_v31 = vld [vmem:[%s4422_s1 + $0xf8] sm:$0xf] }
  0x26   :  { %v351_v41 = vrot.slane %v3674_v36, 2  ;;  %v2812_v45 = vld [vmem:[%s4422_s1 + $0x118] sm:$0xff]  ;;  %v353_v56 = vrot.slane %v3700_v49, 2  ;;  %v355_v58 = vrot.slane %v3705_v50, 2  ;;  %v3219_v10 = vpack.c.bf16 %v2815_v9, %v2813_v7 }
  0x27   :  { %2765 = vmatmul.mubr.msk.f32.gmra.mrb[4].mxu0 %vm102_vm5, %v85_v53  ;;  %v345_v42 = vsel %vm342_vm6, %v343_v34, %v344_v35  ;;  %v347_v47 = vsel %vm342_vm6, %v344_v35, %v346_v37  ;;  %v3212_v53 = vpack.c.bf16 %v2812_v45, %v2810_v44  ;;  %v349_v54 = vsel %vm342_vm6, %v346_v37, %v348_v38  ;;  %v2816_v50 = vld [vmem:[%s4422_s1 + $0x138] sm:$0xf] }
  0x28   :  { %204 = vmatprep.mubr.f32.mxu0 %v3504_v0  ;;  %v352_v55 = vsel %vm342_vm6, %v350_v40, %v351_v41  ;;  %v356_v59 = vsel %vm342_vm6, %v353_v56, %v355_v58  ;;  %v3216_v6 = vpack.c.bf16 %v2816_v50, %v2814_v2  ;;  %v808_v21 = vlaneseq }
  0x29   :  { %v3507_v27 = vmov 1983009808   ;;  %vm1184_vm13 = vcmask 1047559   ;;  %vm3508_vm14 = vmmov 0   ;;  %vm2624_vm15 = vcmask 523264  }
  0x2a   :  { %v3927_v22 = vshrl.u32 %v808_v21, 7  ;;  %v856_v28 = vunpack.c.l.s4 %v3507_v27  ;;  %vm2693_vm0 = vcmask 261120  }
  0x2b   :  { %2766 = vmatmul.mubr.msk.f32.gmra.mrb[6].mxu0 %vm102_vm5, %v88_v57  ;;  %v354_v57 = vsel %vm342_vm6, %v351_v41, %v353_v56 }
  0x2c   :  { %210 = vmatprep.mubr.f32.mxu0 %v3504_v0  ;;  %v810_v24 = vsub.s32 0, %v3927_v22  ;;  %v857_v34 = vunpack.c.0.s8 %v856_v28 }
  0x2e   :  { %v3945_v41 = vsub.s32 %v857_v34, %v3927_v22 }
  0x2f   :  { %2767 = vmatmul.mubr.msk.f32.gmra.mrb[8].mxu0 %vm102_vm5, %v90_v16  ;;  %v3315_v16 = vld [vmem:[#allocation2 + $0xe0] ss:$8 sps:$4 sm:$0xff]  }
  0x30   :  { %216 = vmatprep.mubr.f32.mxu0 %v3504_v0 }
  0x33   :  { %2768 = vmatmul.mubr.msk.f32.gmra.mrb[10].mxu0 %vm102_vm5, %v92_v20  ;;  %v3506_v20 = vmov 0  }
  0x34   :  { %305 = vmatprep.mubr.f32.mxu0 %v3504_v0  ;;  %1314 = vmatprep.mubr.bf16.mxu1 %v3506_v20 }
  0x37   :  { %2771 = vmatmul.mubr.msk.f32.vlgmr.msra.gmra.mrb[0].mxu0 %vm102_vm5, %v3615_v13  ;;  %v2793_v13 = vld [vmem:[%s4422_s1 + $0xc0] sm:$0xff] }
  0x38   :  { %3195 = vmatpush1.bf16.msra.mxu0 %v3194_v26  ;;  %311 = vmatprep.mubr.f32.mxu0 %v3504_v0  ;;  %v814_v26 = vsub.s32 1, %v3927_v22 }
  0x39   :  { %3198 = vmatprep.subr.msk.bf16.mxu0 %vm3584_vm2, %v3196_v29  ;;  %v3936_v29 = vrot.slane %v806_v25, %v810_v24 }
  0x3b   :  { %2772 = vmatmul.mubr.msk.f32.gmra.mrb[2].mxu0 %vm102_vm5, %v3620_v14  ;;  %v2795_v14 = vld [vmem:[%s4422_s1 + $0xd0] sm:$0xff] }
  0x3c   :  { %317 = vmatprep.mubr.f32.mxu0 %v3504_v0  ;;  %3201 = vmatpush1.bf16.msk.msra.mxu0 %vm3584_vm2, %v3199_v30  ;;  %v3204_v43 = vpack.c.bf16 %v2795_v14, %v2793_v13  ;;  %v3940_v30 = vrot.slane %v806_v25, %v814_v26 }
  0x3d   :  { %3203 = vmatprep.subr.bf16.mxu0 %v3202_v33 }
  0x3f   :  { %2773 = vmatmul.mubr.msk.f32.gmra.mrb[4].mxu0 %vm102_vm5, %v3641_v23  ;;  %v2798_v23 = vld [vmem:[%s4422_s1 + $0xe8] sm:$0xff] }
  0x40   :  { %323 = vmatprep.mubr.f32.mxu0 %v3504_v0  ;;  %v3206_v46 = vpack.c.bf16 %v2800_v31, %v2798_v23 }
  0x43   :  { %2774 = vmatmul.mubr.msk.f32.gmra.mrb[6].mxu0 %vm102_vm5, %v3663_v32  ;;  %v2797_v32 = vld [vmem:[%s4422_s1 + $0xe0] sm:$0xff] }
  0x44   :  { %329 = vmatprep.mubr.f32.mxu0 %v3504_v0 }
  0x47   :  { %2775 = vmatmul.mubr.msk.f32.gmra.mrb[8].mxu0 %vm102_vm5, %v3674_v36  ;;  %v2799_v36 = vld [vmem:[%s4422_s1 + $0xf0] sm:$0xf] }
  0x48   :  { %335 = vmatprep.mubr.f32.mxu0 %v3504_v0  ;;  %v3209_v48 = vpack.c.bf16 %v2799_v36, %v2797_v32 }
  0x4b   :  { %2776 = vmatmul.mubr.msk.f32.gmra.mrb[10].mxu0 %vm102_vm5, %v3700_v49  ;;  %v2811_v49 = vld [vmem:[%s4422_s1 + $0x110] sm:$0xff] }
  0x4c   :  { %448 = vmatprep.mubr.f32.mxu0 %v3504_v0  ;;  %v3214_v5 = vpack.c.bf16 %v2811_v49, %v2809_v60 }
  0x4f   :  { %2787 = vmatmul.mubr.msk.f32.vlgmr.msra.gmra.mrb[0].mxu0 %vm102_vm5, %v345_v42 }
  0x50   :  { %3205 = vmatpush1.bf16.msra.mxu0 %v3204_v43  ;;  %454 = vmatprep.mubr.f32.mxu0 %v3504_v0 }
  0x51   :  { %3208 = vmatprep.subr.msk.bf16.mxu0 %vm3584_vm2, %v3206_v46 }
  0x53   :  { %2788 = vmatmul.mubr.msk.f32.gmra.mrb[2].mxu0 %vm102_vm5, %v347_v47 }
  0x54   :  { %460 = vmatprep.mubr.f32.mxu0 %v3504_v0  ;;  %3211 = vmatpush1.bf16.msk.msra.mxu0 %vm3584_vm2, %v3209_v48 }
  0x55   :  { %3213 = vmatprep.subr.bf16.mxu0 %v3212_v53 }
  0x57   :  { %2789 = vmatmul.mubr.msk.f32.gmra.mrb[4].mxu0 %vm102_vm5, %v349_v54 }
  0x58   :  { %466 = vmatprep.mubr.f32.mxu0 %v3504_v0 }
  0x5b   :  { %2790 = vmatmul.mubr.msk.f32.gmra.mrb[6].mxu0 %vm102_vm5, %v352_v55 }
  0x5c   :  { %472 = vmatprep.mubr.f32.mxu0 %v3504_v0 }
  0x5f   :  { %2791 = vmatmul.mubr.msk.f32.gmra.mrb[8].mxu0 %vm102_vm5, %v354_v57 }
  0x60   :  { %478 = vmatprep.mubr.f32.mxu0 %v3504_v0 }
  0x63   :  { %2792 = vmatmul.mubr.msk.f32.gmra.mrb[10].mxu0 %vm102_vm5, %v356_v59 }
  0x64   :  { %603 = vmatprep.mubr.f32.mxu0 %v3504_v0 }
  0x67   :  { %2803 = vmatmul.mubr.msk.f32.vlgmr.msra.gmra.mrb[0].mxu0 %vm102_vm5, %v3683_v39  ;;  %v3297_v39 = vld [vmem:[#allocation2 + $0x80] ss:$8 sps:$4 sm:$0xff]  }
  0x68   :  { %3215 = vmatpush1.bf16.msra.mxu0 %v3214_v5  ;;  %609 = vmatprep.mubr.f32.mxu0 %v3504_v0 }
  0x69   :  { %3218 = vmatprep.subr.msk.bf16.mxu0 %vm3584_vm2, %v3216_v6  ;;  %1283 = vmatpush1.bf16.msra.mxu1 %v3297_v39 }
  0x6b   :  { %2804 = vmatmul.mubr.msk.f32.gmra.mrb[2].mxu0 %vm102_vm5, %v3708_v51  ;;  %v3298_v51 = vld [vmem:[#allocation2 + $0x94] ss:$8 sps:$4 sm:$0xff]  }
  0x6c   :  { %615 = vmatprep.mubr.f32.mxu0 %v3504_v0  ;;  %3221 = vmatpush1.bf16.msk.msra.mxu0 %vm3584_vm2, %v3219_v10 }
  0x6d   :  { %3072 = vmatprep.subr.bf16.mxu0 %v3504_v0  ;;  %1284 = vmatprep.subr.bf16.mxu1 %v3298_v51 }
  0x6f   :  { %2805 = vmatmul.mubr.msk.f32.gmra.mrb[4].mxu0 %vm102_vm5, %v3711_v52  ;;  %v3300_v52 = vld [vmem:[#allocation2 + $0x90] ss:$8 sps:$4 sm:$0xff]  }
  0x70   :  { %621 = vmatprep.mubr.f32.mxu0 %v3504_v0  ;;  %1285 = vmatpush1.bf16.msra.mxu1 %v3300_v52 }
  0x73   :  { %2806 = vmatmul.mubr.msk.f32.gmra.mrb[6].mxu0 %vm102_vm5, %v3725_v61  ;;  %v3301_v61 = vld [vmem:[#allocation2 + $0xa4] ss:$8 sps:$4 sm:$0xff]  }
  0x74   :  { %627 = vmatprep.mubr.f32.mxu0 %v3504_v0  ;;  %1286 = vmatprep.subr.bf16.mxu1 %v3301_v61 }
  0x77   :  { %2807 = vmatmul.mubr.msk.f32.gmra.mrb[8].mxu0 %vm102_vm5, %v3728_v62  ;;  %v3303_v62 = vld [vmem:[#allocation2 + $0xa0] ss:$8 sps:$4 sm:$0xff]  }
  0x78   :  { %633 = vmatprep.mubr.f32.mxu0 %v3504_v0  ;;  %1287 = vmatpush1.bf16.msra.mxu1 %v3303_v62 }
  0x7b   :  { %2808 = vmatmul.mubr.msk.f32.gmra.mrb[10].mxu0 %vm102_vm5, %v3731_v63  ;;  %v3304_v63 = vld [vmem:[#allocation2 + $0xb4] ss:$8 sps:$4 sm:$0xff]  }
  0x7c   :  { %757 = vmatprep.mubr.f32.mxu0 %v3504_v0  ;;  %1288 = vmatprep.subr.bf16.mxu1 %v3304_v63 }
  0x7f   :  { %2819 = vmatmul.mubr.msk.f32.vlgmr.msra.gmra.mrb[0].mxu0 %vm102_vm5, %v3736_v3  ;;  %v3306_v3 = vld [vmem:[#allocation2 + $0xb0] ss:$8 sps:$4 sm:$0xff]  }
  0x80   :  { %763 = vmatprep.mubr.f32.mxu0 %v3504_v0  ;;  %1289 = vmatpush1.bf16.msra.mxu1 %v3306_v3 }
  0x83   :  { %2820 = vmatmul.mubr.msk.f32.gmra.mrb[2].mxu0 %vm102_vm5, %v3739_v4  ;;  %v3307_v4 = vld [vmem:[#allocation2 + $0xc4] ss:$8 sps:$4 sm:$0xff]  }
  0x84   :  { %769 = vmatprep.mubr.f32.mxu0 %v3504_v0  ;;  %1290 = vmatprep.subr.bf16.mxu1 %v3307_v4 }
  0x87   :  { %2821 = vmatmul.mubr.msk.f32.gmra.mrb[4].mxu0 %vm102_vm5, %v3746_v8  ;;  %v3309_v8 = vld [vmem:[#allocation2 + $0xc0] ss:$8 sps:$4 sm:$0xff]  }
  0x88   :  { %775 = vmatprep.mubr.f32.mxu0 %v3504_v0  ;;  %1291 = vmatpush1.bf16.msra.mxu1 %v3309_v8 }
  0x8b   :  { %2822 = vmatmul.mubr.msk.f32.gmra.mrb[6].mxu0 %vm102_vm5, %v3751_v11  ;;  %v3310_v11 = vld [vmem:[#allocation2 + $0xd4] ss:$8 sps:$4 sm:$0xff]  }
  0x8c   :  { %781 = vmatprep.mubr.f32.mxu0 %v3504_v0  ;;  %1292 = vmatprep.subr.bf16.mxu1 %v3310_v11 }
  0x8f   :  { %2823 = vmatmul.mubr.msk.f32.gmra.mrb[8].mxu0 %vm102_vm5, %v3754_v12  ;;  %v3312_v12 = vld [vmem:[#allocation2 + $0xd0] ss:$8 sps:$4 sm:$0xff]  }
  0x90   :  { %787 = vmatprep.mubr.f32.mxu0 %v3504_v0  ;;  %1293 = vmatpush1.bf16.msra.mxu1 %v3312_v12 }
  0x93   :  { %2824 = vmatmul.mubr.msk.f32.gmra.mrb[10].mxu0 %vm102_vm5, %v3757_v15  ;;  %v3313_v15 = vld [vmem:[#allocation2 + $0xe4] ss:$8 sps:$4 sm:$0xff]  }
  0x94   :  { %1294 = vmatprep.subr.bf16.mxu1 %v3313_v15  ;;  %3088 = vmatprep.mubr.msk.bf16.mxu0 %vm3508_vm14, %v3504_v0 }
  0x95   :  { %1295 = vmatpush1.bf16.msra.mxu1 %v3315_v16 }
  0x96   :  { %1296 = vmatprep.subr.bf16.mxu1 %v3316_v17 }
  0x99   :  { %1297 = vmatpush1.bf16.msra.mxu1 %v3318_v18 }
  0x9a   :  { %1439 = vmatprep.subr.bf16.mxu1 %v3321_v19 }
 0x152   :  { %v759_v33 = vpop.f32.mrb[0].mxu0 }
 0x153   :  { %v818_v35 = vadd.f32 %v3936_v29, %v759_v33  ;;  %v761_v37 = vpop.f32.mrb[1].mxu0 }
 0x154   :  { %v819_v38 = vadd.f32 %v3940_v30, %v761_v37 }
 0x155   :  { %v830_v40 = vmax.f32 %v818_v35, 0.0 }
 0x156   :  { %v831_v13 = vmax.f32 %v819_v38, 0.0  ;;  %v765_v14 = vpop.f32.mrb[2].mxu0 }
 0x157   :  { %v820_v23 = vadd.f32 %v3936_v29, %v765_v14  ;;  %v767_v31 = vpop.f32.mrb[3].mxu0 }
 0x158   :  { %v842_v32 = vmax.f32 %v830_v40, %v831_v13  ;;  %v821_v36 = vadd.f32 %v3940_v30, %v767_v31 }
 0x159   :  { %v832_v42 = vmax.f32 %v820_v23, 0.0 }
 0x15a   :  { %v854_v43 = vcombine.high %v842_v32, %v842_v32  ;;  %v861_v44 = vrot.slane %v842_v32, %v3945_v41  ;;  %v833_v45 = vmax.f32 %v821_v36, 0.0  ;;  %v771_v46 = vpop.f32.mrb[4].mxu0 }
 0x15b   :  { %v822_v47 = vadd.f32 %v3936_v29, %v771_v46  ;;  %v773_v48 = vpop.f32.mrb[5].mxu0 }
 0x15c   :  { %v868_v53 = vrot.slane %v854_v43, %v3945_v41  ;;  %v869_v54 = vcombine.high %v861_v44, %v861_v44  ;;  %v2825_v55 = vrot.slane %v861_v44, 9  ;;  %v843_v56 = vmax.f32 %v832_v42, %v833_v45 }
 0x15d   :  { %v834_v57 = vmax.f32 %v822_v47, 0.0  ;;  %v823_v58 = vadd.f32 %v3940_v30, %v773_v48 }
 0x15e   :  { %v870_v59 = vcombine.high %v868_v53, %v868_v53  ;;  %v2826_v60 = vrot.slane %v869_v54, 9  ;;  %v2827_v49 = vrot.slane %v868_v53, 9  ;;  %v1052_v2 = vmax.f32 %v861_v44, %v2825_v55  ;;  %v777_v50 = vpop.f32.mrb[6].mxu0 }
 0x15f   :  { %v871_v5 = vcombine.high %v843_v56, %v843_v56  ;;  %v878_v6 = vrot.slane %v843_v56, %v3945_v41  ;;  %v835_v7 = vmax.f32 %v823_v58, 0.0  ;;  %v779_v9 = vpop.f32.mrb[7].mxu0  ;;  %v824_v47 = vadd.f32 %v3936_v29, %v777_v50 }
 0x160   :  { %v2828_v10 = vrot.slane %v870_v59, 9  ;;  %v1053_v1 = vmax.f32 %v869_v54, %v2826_v60  ;;  %v1054_v39 = vmax.f32 %v868_v53, %v2827_v49  ;;  %v1076_v51 = vpack.c.bf16 %v1052_v2, %v1052_v2 }
 0x161   :  { %v885_v52 = vrot.slane %v871_v5, %v3945_v41  ;;  %v886_v61 = vcombine.high %v878_v6, %v878_v6  ;;  %v2829_v62 = vrot.slane %v878_v6, 9  ;;  %v844_v63 = vmax.f32 %v834_v57, %v835_v7 }
 0x162   :  { %v1055_v3 = vmax.f32 %v870_v59, %v2828_v10  ;;  %v1077_v4 = vpack.c.bf16 %v1053_v1, %v1053_v1  ;;  %v1078_v8 = vpack.c.bf16 %v1054_v39, %v1054_v39  ;;  %v1327_v11 = vunpack.c.l.b16 %v1076_v51  ;;  %v783_v12 = vpop.f32.mrb[8].mxu0 }
 0x163   :  { %v887_v15 = vcombine.high %v885_v52, %v885_v52  ;;  %v2830_v16 = vrot.slane %v886_v61, 9  ;;  %v2831_v17 = vrot.slane %v885_v52, 9  ;;  %v1056_v18 = vmax.f32 %v878_v6, %v2829_v62  ;;  %v785_v19 = vpop.f32.mrb[9].mxu0 }
 0x164   :  { %v1079_v21 = vpack.c.bf16 %v1055_v3, %v1055_v3  ;;  %v1149_v25 = vunpack.c.l.b16 %v1077_v4  ;;  %v1150_v27 = vunpack.c.l.b16 %v1078_v8  ;;  %v888_v28 = vcombine.high %v844_v63, %v844_v63 }
 0x165   :  { %v2832_v33 = vrot.slane %v887_v15, 9  ;;  %v1057_v34 = vmax.f32 %v886_v61, %v2830_v16  ;;  %v1058_v35 = vmax.f32 %v885_v52, %v2831_v17  ;;  %v1080_v37 = vpack.c.bf16 %v1056_v18, %v1056_v18 }
 0x166   :  { %v3955_v38 = vunpack.c.l.b16 %v1079_v21  ;;  %v1165_v40 = vrot.slane %v1150_v27, 7  ;;  %v1329_v13 = vrot.slane %v1149_v25, 7  ;;  %v1331_v14 = vrot.slane %v1150_v27, 6  ;;  %v789_v23 = vpop.f32.mrb[10].mxu0 }
 0x167   :  { %v1059_v31 = vmax.f32 %v887_v15, %v2832_v33  ;;  %v1081_v32 = vpack.c.bf16 %v1057_v34, %v1057_v34  ;;  %v1082_v36 = vpack.c.bf16 %v1058_v35, %v1058_v35  ;;  %v3957_v42 = vunpack.c.l.b16 %v1080_v37  ;;  %v791_v43 = vpop.f32.mrb[11].mxu0 }
 0x168   :  { %v1330_v44 = vsel %vm1166_vm7, %v1329_v13, %v1327_v11  ;;  %v1503_v45 = vrot.slane %v3955_v38, 7  ;;  %v895_v46 = vrot.slane %v844_v63, %v3945_v41  ;;  %v3964_v48 = vsel %vm1166_vm7, %v1165_v40, %v1149_v25 }
 0x169   :  { %v3967_v53 = vsel %vm1169_vm8, %v1331_v14, %v1330_v44  ;;  %v1083_v54 = vpack.c.bf16 %v1059_v31, %v1059_v31  ;;  %v3969_v55 = vunpack.c.l.b16 %v1081_v32  ;;  %v3974_v57 = vunpack.c.l.b16 %v1082_v36 }
 0x16a   :  { %v3972_v56 = vsel %vm1166_vm7, %v1503_v45, %v1150_v27  ;;  %v1505_v58 = vrot.slane %v3957_v42, 6  ;;  %v902_v59 = vrot.slane %v888_v28, %v3945_v41  ;;  %v1681_v49 = vrot.slane %v3957_v42, 7 }
 0x16b   :  { %v3978_v60 = vunpack.c.l.b16 %v1083_v54  ;;  %v903_v2 = vcombine.high %v895_v46, %v895_v46  ;;  %v2833_v50 = vrot.slane %v895_v46, 9  ;;  %v836_v7 = vmax.f32 %v824_v47, 0.0 }
 0x16c   :  { %v904_v5 = vcombine.high %v902_v59, %v902_v59  ;;  %v2835_v6 = vrot.slane %v902_v59, 9  ;;  %v825_v10 = vadd.f32 %v3940_v30, %v779_v9  ;;  %v826_v51 = vadd.f32 %v3936_v29, %v783_v12 }
 0x16d   :  { %v2834_v1 = vrot.slane %v903_v2, 9  ;;  %v1060_v39 = vmax.f32 %v895_v46, %v2833_v50  ;;  %v827_v52 = vadd.f32 %v3940_v30, %v785_v19  ;;  %v3985_v3 = vadd.f32 %v3936_v29, %v789_v23 }
 0x16e   :  { %v2836_v61 = vrot.slane %v904_v5, 9  ;;  %v1062_v62 = vmax.f32 %v902_v59, %v2835_v6  ;;  %v837_v63 = vmax.f32 %v825_v10, 0.0  ;;  %v838_v11 = vmax.f32 %v826_v51, 0.0 }
 0x16f   :  { %v1061_v4 = vmax.f32 %v903_v2, %v2834_v1  ;;  %v1084_v8 = vpack.c.bf16 %v1060_v39, %v1060_v39  ;;  %v839_v15 = vmax.f32 %v827_v52, 0.0  ;;  %v1859_v16 = vrot.slane %v3969_v55, 7 }
 0x170   :  { %v3988_v17 = vmax.f32 %v904_v5, %v2836_v61  ;;  %v1086_v9 = vpack.c.bf16 %v1062_v62, %v1062_v62  ;;  %v845_v18 = vmax.f32 %v836_v7, %v837_v63  ;;  %v840_v25 = vmax.f32 %v3985_v3, 0.0 }
 0x171   :  { %v1085_v21 = vpack.c.bf16 %v1061_v4, %v1061_v4  ;;  %v3990_v12 = vunpack.c.l.b16 %v1084_v8  ;;  %v846_v19 = vmax.f32 %v838_v11, %v839_v15  ;;  %v829_v33 = vadd.f32 %v3940_v30, %v791_v43 }
 0x172   :  { %v3993_v27 = vunpack.c.l.b16 %v1086_v9  ;;  %v905_v29 = vcombine.high %v845_v18, %v845_v18  ;;  %v912_v28 = vrot.slane %v845_v18, %v3945_v41  ;;  %v1168_v40 = vrot.slane %v3955_v38, 6 }
 0x173   :  { %v3997_v34 = vunpack.c.l.b16 %v1085_v21  ;;  %v922_v35 = vcombine.high %v846_v19, %v846_v19  ;;  %v929_v37 = vrot.slane %v846_v19, %v3945_v41  ;;  %v1865_v13 = vrot.slane %v3990_v12, 4 }
 0x174   :  { %v919_v14 = vrot.slane %v905_v29, %v3945_v41  ;;  %v920_v23 = vcombine.high %v912_v28, %v912_v28  ;;  %v2837_v31 = vrot.slane %v912_v28, 9  ;;  %v1869_v32 = vrot.slane %v3993_v27, 2 }
 0x175   :  { %v936_v36 = vrot.slane %v922_v35, %v3945_v41  ;;  %v937_v44 = vcombine.high %v929_v37, %v929_v37  ;;  %v2841_v45 = vrot.slane %v929_v37, 9  ;;  %v1867_v61 = vrot.slane %v3997_v34, 3 }
 0x176   :  { %v921_v30 = vcombine.high %v919_v14, %v919_v14  ;;  %v2838_v43 = vrot.slane %v920_v23, 9  ;;  %v2839_v46 = vrot.slane %v919_v14, 9  ;;  %v1064_v47 = vmax.f32 %v912_v28, %v2837_v31 }
 0x177   :  { %v938_v54 = vcombine.high %v936_v36, %v936_v36  ;;  %v2842_v59 = vrot.slane %v937_v44, 9  ;;  %v2843_v2 = vrot.slane %v936_v36, 9  ;;  %v1068_v50 = vmax.f32 %v929_v37, %v2841_v45 }
 0x178   :  { %v2840_v5 = vrot.slane %v921_v30, 9  ;;  %v1065_v6 = vmax.f32 %v920_v23, %v2838_v43  ;;  %v1066_v7 = vmax.f32 %v919_v14, %v2839_v46  ;;  %v1088_v10 = vpack.c.bf16 %v1064_v47, %v1064_v47 }
 0x179   :  { %v2844_v1 = vrot.slane %v938_v54, 9  ;;  %v1069_v39 = vmax.f32 %v937_v44, %v2842_v59  ;;  %v1070_v51 = vmax.f32 %v936_v36, %v2843_v2  ;;  %v1092_v52 = vpack.c.bf16 %v1068_v50, %v1068_v50 }
 0x17a   :  { %v1067_v62 = vmax.f32 %v921_v30, %v2840_v5  ;;  %v1089_v63 = vpack.c.bf16 %v1065_v6, %v1065_v6  ;;  %v1090_v3 = vpack.c.bf16 %v1066_v7, %v1066_v7  ;;  %v841_v19 = vmax.f32 %v829_v33, 0.0 }
 0x17b   :  { %v1071_v4 = vmax.f32 %v938_v54, %v2844_v1  ;;  %v1093_v8 = vpack.c.bf16 %v1069_v39, %v1069_v39  ;;  %v1094_v11 = vpack.c.bf16 %v1070_v51, %v1070_v51  ;;  %v4006_v15 = vunpack.c.l.b16 %v1092_v52 }
 0x17c   :  { %v1091_v9 = vpack.c.bf16 %v1067_v62, %v1067_v62  ;;  %v1157_v18 = vunpack.c.l.b16 %v1089_v63  ;;  %v1158_v21 = vunpack.c.l.b16 %v1090_v3  ;;  %v1328_v29 = vunpack.c.l.b16 %v1088_v10 }
 0x17d   :  { %v1095_v28 = vpack.c.bf16 %v1071_v4, %v1071_v4  ;;  %v4008_v35 = vunpack.c.l.b16 %v1093_v8  ;;  %v4010_v37 = vunpack.c.l.b16 %v1094_v11  ;;  %v1519_v36 = vrot.slane %v4006_v15, 6 }
 0x17e   :  { %v4012_v14 = vunpack.c.l.b16 %v1091_v9  ;;  %v1186_v23 = vrot.slane %v1158_v21, 7  ;;  %v1343_v31 = vrot.slane %v1157_v18, 7  ;;  %v1345_v44 = vrot.slane %v1158_v21, 6 }
 0x17f   :  { %v4015_v45 = vunpack.c.l.b16 %v1095_v28  ;;  %v1695_v30 = vrot.slane %v4006_v15, 7  ;;  %v847_v43 = vmax.f32 %v840_v25, %v841_v19  ;;  %v1873_v47 = vrot.slane %v4008_v35, 7 }
 0x180   :  { %v1187_v33 = vsel %vm1166_vm7, %v1186_v23, %v1157_v18  ;;  %v1517_v46 = vrot.slane %v4012_v14, 7  ;;  %v1170_v54 = vsel %vm1169_vm8, %v1168_v40, %v3964_v48  ;;  %v1344_v59 = vsel %vm1166_vm7, %v1343_v31, %v1328_v29 }
 0x181   :  { %v939_v2 = vcombine.high %v847_v43, %v847_v43  ;;  %v946_v50 = vrot.slane %v847_v43, %v3945_v41  ;;  %v1171_v5 = vrot.slane %v3957_v42, 5  ;;  %v1174_v25 = vrot.slane %v3969_v55, 4 }
 0x182   :  { %v4027_v6 = vsel %vm1166_vm7, %v1517_v46, %v1158_v21  ;;  %v1177_v7 = vrot.slane %v3974_v57, 3  ;;  %v1180_v10 = vrot.slane %v3978_v60, 2  ;;  %v1183_v52 = vrot.slane %v3990_v12, 1 }
 0x183   :  { %v953_v1 = vrot.slane %v939_v2, %v3945_v41  ;;  %v954_v39 = vcombine.high %v946_v50, %v946_v50  ;;  %v2845_v48 = vrot.slane %v946_v50, 9  ;;  %v1173_v40 = vsel %vm1172_vm9, %v1171_v5, %v1170_v54 }
 0x184   :  { %v1176_v51 = vsel %vm1175_vm10, %v1174_v25, %v1173_v40  ;;  %v1188_v62 = vrot.slane %v4012_v14, 6  ;;  %v1190_v63 = vrot.slane %v4006_v15, 5  ;;  %v1192_v21 = vrot.slane %v4008_v35, 4 }
 0x185   :  { %v955_v3 = vcombine.high %v953_v1, %v953_v1  ;;  %v2846_v4 = vrot.slane %v954_v39, 9  ;;  %v2847_v8 = vrot.slane %v953_v1, 9  ;;  %v1072_v11 = vmax.f32 %v946_v50, %v2845_v48 }
 0x186   :  { %v1179_v9 = vsel %vm1178_vm11, %v1177_v7, %v1176_v51  ;;  %v1189_v18 = vsel %vm1169_vm8, %v1188_v62, %v1187_v33  ;;  %v1194_v19 = vrot.slane %v4010_v37, 3  ;;  %v1196_v54 = vrot.slane %v4015_v45, 2 }
 0x187   :  { %v2848_v29 = vrot.slane %v955_v3, 9  ;;  %v1073_v28 = vmax.f32 %v954_v39, %v2846_v4  ;;  %v1074_v23 = vmax.f32 %v953_v1, %v2847_v8  ;;  %v1096_v31 = vpack.c.bf16 %v1072_v11, %v1072_v11  ;;  %v3319_v11 = vld [vmem:[#allocation2] ss:$8 sps:$4 sm:$0xff]  }
 0x188   :  { %v1182_v43 = vsel %vm1181_vm12, %v1180_v10, %v1179_v9  ;;  %v1191_v46 = vsel %vm1172_vm9, %v1190_v63, %v1189_v18  ;;  %v1333_v2 = vrot.slane %v3955_v38, 5  ;;  %v1346_v50 = vsel %vm1169_vm8, %v1345_v44, %v1344_v59 }
 0x189   :  { %v1097_v5 = vpack.c.bf16 %v1073_v28, %v1073_v28  ;;  %v1098_v33 = vpack.c.bf16 %v1074_v23, %v1074_v23  ;;  %v4047_v25 = vunpack.c.l.b16 %v1096_v31  ;;  %v1185_v7 = vsel %vm1184_vm13, %v1183_v52, %v1182_v43  ;;  %v3324_v28 = vld [vmem:[#allocation2 + $0x14] ss:$8 sps:$4 sm:$0xff]  }
 0x18a   :  { %v1193_v39 = vsel %vm1175_vm10, %v1192_v21, %v1191_v46  ;;  %v1334_v1 = vsel %vm1172_vm9, %v1333_v2, %v3967_v53  ;;  %v1335_v10 = vrot.slane %v3957_v42, 4  ;;  %v4054_v48 = vmax.f32 %v955_v3, %v2848_v29 }
 0x18b   :  { %v4056_v40 = vunpack.c.l.b16 %v1097_v5  ;;  %v4058_v51 = vunpack.c.l.b16 %v1098_v33  ;;  %v1195_v44 = vsel %vm1178_vm11, %v1194_v19, %v1193_v39  ;;  %v1198_v62 = vrot.slane %v4047_v25, 1 }
 0x18c   :  { %v1197_v59 = vsel %vm1181_vm12, %v1196_v54, %v1195_v44  ;;  %v1336_v52 = vsel %vm1175_vm10, %v1335_v10, %v1334_v1  ;;  %v1337_v63 = vrot.slane %v3969_v55, 3  ;;  %v1879_v53 = vrot.slane %v4047_v25, 4  ;;  %v3322_v10 = vld [vmem:[#allocation2 + $0x10] ss:$8 sps:$4 sm:$0xff]  }
 0x18d   :  { %v1881_v4 = vrot.slane %v4056_v40, 3  ;;  %v1339_v3 = vrot.slane %v3974_v57, 2  ;;  %v1341_v8 = vrot.slane %v3978_v60, 1  ;;  %v1199_v9 = vsel %vm1184_vm13, %v1198_v62, %v1197_v59  ;;  %v3327_v62 = vld [vmem:[#allocation2 + $0x24] ss:$8 sps:$4 sm:$0xff]  }
 0x18e   :  { %v1338_v18 = vsel %vm1178_vm11, %v1337_v63, %v1336_v52  ;;  %v1347_v21 = vrot.slane %v4012_v14, 5  ;;  %v1349_v19 = vrot.slane %v4006_v15, 4  ;;  %v1200_v29 = vpack.c.b16 %v1199_v9, %v1185_v7 }
 0x18f   :  { %v1340_v23 = vsel %vm1181_vm12, %v1339_v3, %v1338_v18  ;;  %v1351_v31 = vrot.slane %v4008_v35, 3  ;;  %v1353_v43 = vrot.slane %v4010_v37, 2  ;;  %v1355_v2 = vrot.slane %v4015_v45, 1 }
 0x190   :  { %v4077_v46 = vsel %vm1184_vm13, %v1341_v8, %v1340_v23  ;;  %v1348_v54 = vsel %vm1172_vm9, %v1347_v21, %v1346_v50  ;;  %v1506_v5 = vsel %vm1169_vm8, %v1505_v58, %v3972_v56  ;;  %1315 = vmatmul.mubr.bf16.vlgmr.msra.gmra.mrb[0].mxu1 %v1200_v29  ;;  %v1507_v7 = vrot.slane %v3969_v55, 5  ;;  %v3415_v50 = vld [vmem:[%s4426_s5 + $0x40] sm:$0xff]  }
 0x191   :  { %v1350_v33 = vsel %vm1175_vm10, %v1349_v19, %v1348_v54  ;;  %v1509_v39 = vrot.slane %v3974_v57, 4  ;;  %v1511_v1 = vrot.slane %v3978_v60, 3  ;;  %1440 = vmatpush1.bf16.msra.mxu1 %v3319_v11  ;;  %1471 = vmatprep.mubr.bf16.mxu1 %v3506_v20  ;;  %v1513_v56 = vrot.slane %v3990_v12, 2  ;;  %v3417_v11 = vld [vmem:[%s4426_s5 + $0x48] sm:$0xff]  }
 0x192   :  { %v1352_v44 = vsel %vm1178_vm11, %v1351_v31, %v1350_v33  ;;  %v1515_v58 = vrot.slane %v3997_v34, 1  ;;  %v1520_v59 = vsel %vm1169_vm8, %v1519_v36, %v4027_v6  ;;  %1441 = vmatprep.subr.bf16.mxu1 %v3324_v28  ;;  %v1508_v63 = vsel %vm1172_vm9, %v1507_v7, %v1506_v5  ;;  %3073 = vmatpush3.bf16.msra.mxu0 %v3415_v50  ;;  %v3325_v23 = vld [vmem:[#allocation2 + $0x20] ss:$8 sps:$4 sm:$0xff]   ;;  %v3330_v5 = vld [vmem:[#allocation2 + $0x34] ss:$8 sps:$4 sm:$0xff]  }
 0x193   :  { %v1354_v52 = vsel %vm1181_vm12, %v1353_v43, %v1352_v44  ;;  %v1521_v3 = vrot.slane %v4008_v35, 5  ;;  %v1523_v8 = vrot.slane %v4010_v37, 4  ;;  %v1510_v36 = vsel %vm1175_vm10, %v1509_v39, %v1508_v63  ;;  %3074 = vmatprep.subr.bf16.mxu0 %v3504_v0 }
 0x194   :  { %v4108_v9 = vsel %vm1184_vm13, %v1355_v2, %v1354_v52  ;;  %v1525_v6 = vrot.slane %v4015_v45, 3  ;;  %v1527_v18 = vrot.slane %v4047_v25, 2  ;;  %v1512_v19 = vsel %vm1178_vm11, %v1511_v1, %v1510_v36 }
 0x195   :  { %v1357_v21 = vpack.c.b16 %v4108_v9, %v4077_v46  ;;  %v1522_v29 = vsel %vm1172_vm9, %v1521_v3, %v1520_v59  ;;  %v1529_v28 = vrot.slane %v4056_v40, 1  ;;  %1442 = vmatpush1.bf16.msra.mxu1 %v3322_v10  ;;  %v1514_v31 = vsel %vm1181_vm12, %v1513_v56, %v1512_v19  ;;  %v3358_v46 = vld [vmem:[#allocation2 + $0x150] ss:$8 sps:$4 sm:$0xff]   ;;  %v3363_v9 = vld [vmem:[#allocation2 + $0x164] ss:$8 sps:$4 sm:$0xff]  }
 0x196   :  { %v1524_v43 = vsel %vm1175_vm10, %v1523_v8, %v1522_v29  ;;  %v1682_v54 = vsel %vm1166_vm7, %v1681_v49, %v3955_v38  ;;  %v1683_v2 = vrot.slane %v3969_v55, 6  ;;  %1443 = vmatprep.subr.bf16.mxu1 %v3327_v62  ;;  %v4127_v33 = vsel %vm1184_vm13, %v1515_v58, %v1514_v31  ;;  %3075 = vmatpush3.bf16.msra.mxu0 %v3417_v11  ;;  %v3328_v62 = vld [vmem:[#allocation2 + $0x30] ss:$8 sps:$4 sm:$0xff]   ;;  %v3333_v11 = vld [vmem:[#allocation2 + $0x44] ss:$8 sps:$4 sm:$0xff]  }
 0x197   :  { %v1526_v7 = vsel %vm1178_vm11, %v1525_v6, %v1524_v43  ;;  %v1685_v39 = vrot.slane %v3974_v57, 5  ;;  %v1687_v1 = vrot.slane %v3978_v60, 4  ;;  %v1689_v38 = vrot.slane %v3990_v12, 3  ;;  %3076 = vmatprep.subr.bf16.mxu0 %v3504_v0 }
 0x198   :  { %v1528_v50 = vsel %vm1181_vm12, %v1527_v18, %v1526_v7  ;;  %v1684_v10 = vsel %vm1169_vm8, %v1683_v2, %v1682_v54  ;;  %v1691_v49 = vrot.slane %v3997_v34, 2  ;;  %v1693_v58 = vrot.slane %v3993_v27, 1  ;;  %v3331_v2 = vld [vmem:[#allocation2 + $0x40] ss:$8 sps:$4 sm:$0xff]  }
 0x199   :  { %v4138_v44 = vsel %vm1184_vm13, %v1529_v28, %v1528_v50  ;;  %v1686_v56 = vsel %vm1172_vm9, %v1685_v39, %v1684_v10  ;;  %v1696_v59 = vsel %vm1166_vm7, %v1695_v30, %v4012_v14  ;;  %1444 = vmatpush1.bf16.msra.mxu1 %v3325_v23  ;;  %v1697_v3 = vrot.slane %v4008_v35, 6  ;;  %v3337_v34 = vld [vmem:[#allocation2 + $0x60] ss:$8 sps:$4 sm:$0xff]  }
 0x19a   :  { %v1531_v52 = vpack.c.b16 %v4138_v44, %v4127_v33  ;;  %v1688_v63 = vsel %vm1175_vm10, %v1687_v1, %v1686_v56  ;;  %v1699_v8 = vrot.slane %v4010_v37, 5  ;;  %1445 = vmatprep.subr.bf16.mxu1 %v3330_v5  ;;  %v1701_v6 = vrot.slane %v4015_v45, 4  ;;  %v3336_v1 = vld [vmem:[#allocation2 + $0x54] ss:$8 sps:$4 sm:$0xff]   ;;  %v3382_v33 = vld [vmem:[#allocation2 + $0x1d0] ss:$8 sps:$4 sm:$0xff]  }
 0x19b   :  { %v1690_v36 = vsel %vm1178_vm11, %v1689_v38, %v1688_v63  ;;  %v1703_v18 = vrot.slane %v4047_v25, 3  ;;  %v1705_v14 = vrot.slane %v4056_v40, 2  ;;  %v1698_v19 = vsel %vm1169_vm8, %v1697_v3, %v1696_v59  ;;  %v3342_v25 = vld [vmem:[#allocation2 + $0x74] ss:$8 sps:$4 sm:$0xff]   ;;  %v3345_v40 = vld [vmem:[#allocation2 + $0x104] ss:$8 sps:$4 sm:$0xff]  }
 0x19c   :  { %v1692_v30 = vsel %vm1181_vm12, %v1691_v49, %v1690_v36  ;;  %v1707_v29 = vrot.slane %v4058_v51, 1  ;;  %v1087_v28 = vpack.c.bf16 %v3988_v17, %v3988_v17  ;;  %v1700_v31 = vsel %vm1172_vm9, %v1699_v8, %v1698_v19  ;;  %v3346_v8 = vld [vmem:[#allocation2 + $0x110] ss:$8 sps:$4 sm:$0xff]   ;;  %v3349_v36 = vld [vmem:[#allocation2 + $0x120] ss:$8 sps:$4 sm:$0xff]  }
 0x19d   :  { %v4161_v23 = vsel %vm1184_vm13, %v1693_v58, %v1692_v30  ;;  %v1099_v43 = vpack.c.bf16 %v4054_v48, %v4054_v48  ;;  %v1860_v54 = vsel %vm1166_vm7, %v1859_v16, %v3957_v42  ;;  %1446 = vmatpush1.bf16.msra.mxu1 %v3328_v62  ;;  %v1702_v5 = vsel %vm1175_vm10, %v1701_v6, %v1700_v31  ;;  %v3339_v58 = vld [vmem:[#allocation2 + $0x64] ss:$8 sps:$4 sm:$0xff]   ;;  %v3354_v6 = vld [vmem:[#allocation2 + $0x134] ss:$8 sps:$4 sm:$0xff]   ;;  %v3355_v30 = vld [vmem:[#allocation2 + $0x140] ss:$8 sps:$4 sm:$0xff]  }
 0x19e   :  { %v1857_v7 = vunpack.c.l.b16 %v1087_v28  ;;  %v1861_v17 = vrot.slane %v3974_v57, 6  ;;  %v1863_v39 = vrot.slane %v3978_v60, 5  ;;  %1447 = vmatprep.subr.bf16.mxu1 %v3333_v11  ;;  %v1704_v50 = vsel %vm1178_vm11, %v1703_v18, %v1702_v5  ;;  %v3351_v11 = vld [vmem:[#allocation2 + $0x124] ss:$8 sps:$4 sm:$0xff]   ;;  %v3352_v18 = vld [vmem:[#allocation2 + $0x130] ss:$8 sps:$4 sm:$0xff]  }
 0x19f   :  { %v1858_v10 = vunpack.c.l.b16 %v1099_v43  ;;  %v1874_v55 = vsel %vm1166_vm7, %v1873_v47, %v4006_v15  ;;  %v1875_v42 = vrot.slane %v4010_v37, 6  ;;  %v1883_v16 = vrot.slane %v4058_v51, 2  ;;  %v3334_v15 = vld [vmem:[#allocation2 + $0x50] ss:$8 sps:$4 sm:$0xff]   ;;  %v3360_v19 = vld [vmem:[#allocation2 + $0x154] ss:$8 sps:$4 sm:$0xff]  }
 0x1a0   :  { %v1706_v48 = vsel %vm1181_vm12, %v1705_v14, %v1704_v50  ;;  %v1862_v57 = vsel %vm1169_vm8, %v1861_v17, %v1860_v54  ;;  %v1877_v60 = vrot.slane %v4015_v45, 5  ;;  %v1871_v56 = vrot.slane %v1857_v7, 1  ;;  %v3357_v14 = vld [vmem:[#allocation2 + $0x144] ss:$8 sps:$4 sm:$0xff]   ;;  %v3364_v28 = vld [vmem:[#allocation2 + $0x170] ss:$8 sps:$4 sm:$0xff]  }
 0x1a1   :  { %v4184_v38 = vsel %vm1184_vm13, %v1707_v29, %v1706_v48  ;;  %v1864_v49 = vsel %vm1172_vm9, %v1863_v39, %v1862_v57  ;;  %v1876_v35 = vsel %vm1169_vm8, %v1875_v42, %v1874_v55  ;;  %1448 = vmatpush1.bf16.msra.mxu1 %v3331_v2  ;;  %v1885_v45 = vrot.slane %v1858_v10, 1  ;;  %v3366_v29 = vld [vmem:[#allocation2 + $0x174] ss:$8 sps:$4 sm:$0xff]   ;;  %v3369_v31 = vld [vmem:[#allocation2 + $0x184] ss:$8 sps:$4 sm:$0xff]  }
 0x1a2   :  { %v1709_v37 = vpack.c.b16 %v4184_v38, %v4161_v23  ;;  %v1866_v47 = vsel %vm1175_vm10, %v1865_v13, %v1864_v49  ;;  %v1878_v51 = vsel %vm1172_vm9, %v1877_v60, %v1876_v35  ;;  %1449 = vmatprep.subr.bf16.mxu1 %v3336_v1  ;;  %v3367_v43 = vld [vmem:[#allocation2 + $0x180] ss:$8 sps:$4 sm:$0xff]   ;;  %v3372_v54 = vld [vmem:[#allocation2 + $0x194] ss:$8 sps:$4 sm:$0xff]   ;;  %v3370_v2 = vld [vmem:[#allocation2 + $0x190] ss:$8 sps:$4 sm:$0xff]  }
 0x1a3   :  { %v1868_v59 = vsel %vm1178_vm11, %v1867_v61, %v1866_v47  ;;  %v1880_v62 = vsel %vm1175_vm10, %v1879_v53, %v1878_v51  ;;  %v3343_v53 = vld [vmem:[#allocation2 + $0x100] ss:$8 sps:$4 sm:$0xff]   ;;  %v3375_v5 = vld [vmem:[#allocation2 + $0x1a4] ss:$8 sps:$4 sm:$0xff]   ;;  %v3378_v17 = vld [vmem:[#allocation2 + $0x1b4] ss:$8 sps:$4 sm:$0xff]  }
 0x1a4   :  { %v1870_v63 = vsel %vm1181_vm12, %v1869_v32, %v1868_v59  ;;  %v1882_v12 = vsel %vm1178_vm11, %v1881_v4, %v1880_v62  ;;  %v3340_v32 = vld [vmem:[#allocation2 + $0x70] ss:$8 sps:$4 sm:$0xff]   ;;  %v3348_v4 = vld [vmem:[#allocation2 + $0x114] ss:$8 sps:$4 sm:$0xff]   ;;  %v3373_v7 = vld [vmem:[#allocation2 + $0x1a0] ss:$8 sps:$4 sm:$0xff]  }
 0x1a5   :  { %v4207_v13 = vsel %vm1184_vm13, %v1871_v56, %v1870_v63  ;;  %v1884_v3 = vsel %vm1181_vm12, %v1883_v16, %v1882_v12  ;;  %1450 = vmatpush1.bf16.msra.mxu1 %v3334_v15  ;;  %v3376_v39 = vld [vmem:[#allocation2 + $0x1b0] ss:$8 sps:$4 sm:$0xff]   ;;  %v3381_v1 = vld [vmem:[#allocation2 + $0x1c4] ss:$8 sps:$4 sm:$0xff]   ;;  %v3379_v50 = vld [vmem:[#allocation2 + $0x1c0] ss:$8 sps:$4 sm:$0xff]  }
 0x1a6   :  { %v4211_v61 = vsel %vm1184_vm13, %v1885_v45, %v1884_v3  ;;  %1451 = vmatprep.subr.bf16.mxu1 %v3339_v58  ;;  %v3384_v10 = vld [vmem:[#allocation2 + $0x1d4] ss:$8 sps:$4 sm:$0xff]   ;;  %v3387_v44 = vld [vmem:[#allocation2 + $0x1e4] ss:$8 sps:$4 sm:$0xff]   ;;  %v3388_v42 = vld [vmem:[#allocation2 + $0x1f0] ss:$8 sps:$4 sm:$0xff]  }
 0x1a7   :  { %v1887_v27 = vpack.c.b16 %v4211_v61, %v4207_v13  ;;  %v3390_v55 = vld [vmem:[#allocation2 + $0x1f4] ss:$8 sps:$4 sm:$0xff]   ;;  %v3393_v16 = vld [vmem:[#allocation2 + $0x204] ss:$8 sps:$4 sm:$0xff]   ;;  %v3391_v48 = vld [vmem:[#allocation2 + $0x200] ss:$8 sps:$4 sm:$0xff]  }
 0x1a8   :  { %v3396_v57 = vld [vmem:[#allocation2 + $0x214] ss:$8 sps:$4 sm:$0xff]   ;;  %v3394_v60 = vld [vmem:[#allocation2 + $0x210] ss:$8 sps:$4 sm:$0xff]   ;;  %v3399_v49 = vld [vmem:[#allocation2 + $0x224] ss:$8 sps:$4 sm:$0xff]  }
 0x1a9   :  { %1452 = vmatpush1.bf16.msra.mxu1 %v3337_v34  ;;  %v3397_v56 = vld [vmem:[#allocation2 + $0x220] ss:$8 sps:$4 sm:$0xff]   ;;  %v3402_v35 = vld [vmem:[#allocation2 + $0x234] ss:$8 sps:$4 sm:$0xff]   ;;  %v3400_v15 = vld [vmem:[#allocation2 + $0x230] ss:$8 sps:$4 sm:$0xff]  }
 0x1aa   :  { %1453 = vmatprep.subr.bf16.mxu1 %v3342_v25  ;;  %v3405_v47 = vld [vmem:[#allocation2 + $0x244] ss:$8 sps:$4 sm:$0xff]   ;;  %v3403_v51 = vld [vmem:[#allocation2 + $0x240] ss:$8 sps:$4 sm:$0xff]   ;;  %v3408_v45 = vld [vmem:[#allocation2 + $0x254] ss:$8 sps:$4 sm:$0xff]  }
 0x1ab   :  { %v3406_v23 = vld [vmem:[#allocation2 + $0x250] ss:$8 sps:$4 sm:$0xff]   ;;  %v3411_v38 = vld [vmem:[#allocation2 + $0x264] ss:$8 sps:$4 sm:$0xff]  }
 0x1ac   :  { %v3412_v58 = vld [vmem:[#allocation2 + $0x270] ss:$8 sps:$4 sm:$0xff]   ;;  %v3416_v59 = vld [vmem:[%s4426_s5 + $0x80] sm:$0xff]   ;;  %v3418_v62 = vld [vmem:[%s4426_s5 + $0x88] sm:$0xff]  }
 0x1ad   :  { %1454 = vmatpush1.bf16.msra.mxu1 %v3340_v32  ;;  %v3419_v63 = vld [vmem:[%s4426_s5 + $0x50] sm:$0xff]   ;;  %v3421_v13 = vld [vmem:[%s4426_s5 + $0x58] sm:$0xff]   ;;  %v3423_v34 = vld [vmem:[%s4426_s5 + $0x60] sm:$0xff]  }
 0x1ae   :  { %1613 = vmatprep.subr.bf16.mxu1 %v3345_v40  ;;  %v3420_v12 = vld [vmem:[%s4426_s5 + $0x90] sm:$0xff]   ;;  %3077 = vmatpush3.bf16.msra.mxu0 %v3419_v63  ;;  %v3422_v3 = vld [vmem:[%s4426_s5 + $0x98] sm:$0xff]   ;;  %v3424_v61 = vld [vmem:[%s4426_s5 + $0xa0] sm:$0xff]  }
 0x1af   :  { %3078 = vmatprep.subr.bf16.mxu0 %v3504_v0  ;;  %v3425_v25 = vld [vmem:[%s4426_s5 + $0x68] sm:$0xff]   ;;  %v3427_v32 = vld [vmem:[%s4426_s5 + $0x70] sm:$0xff]  }
 0x1b0   :  { %1472 = vmatmul.mubr.bf16.vlgmr.msra.gmra.mrb[0].mxu1 %v1357_v21  ;;  %v3361_v21 = vld [vmem:[#allocation2 + $0x160] ss:$8 sps:$4 sm:$0xff]   ;;  %v3428_v40 = vld [vmem:[%s4426_s5 + $0xb0] sm:$0xff]  }
 0x1b1   :  { %1614 = vmatpush1.bf16.msra.mxu1 %v3343_v53  ;;  %1645 = vmatprep.mubr.bf16.mxu1 %v3506_v20  ;;  %v3429_v53 = vld [vmem:[%s4426_s5 + $0x78] sm:$0xff]  }
 0x1b2   :  { %1615 = vmatprep.subr.bf16.mxu1 %v3348_v4  ;;  %3079 = vmatpush3.bf16.msra.mxu0 %v3421_v13  ;;  %v3430_v4 = vld [vmem:[%s4426_s5 + $0xb8] sm:$0xff]  }
 0x1b3   :  { %3080 = vmatprep.subr.bf16.mxu0 %v3504_v0 }
 0x1b5   :  { %1616 = vmatpush1.bf16.msra.mxu1 %v3346_v8  ;;  %v2016_v8 = vld [vmem:[%s4425_s4] sm:$0x3] }
 0x1b6   :  { %1617 = vmatprep.subr.bf16.mxu1 %v3351_v11  ;;  %3081 = vmatpush3.bf16.msra.mxu0 %v3423_v34  ;;  %v2021_v11 = vrot.slane %v2016_v8, %v810_v24 }
 0x1b7   :  { %3082 = vmatprep.subr.bf16.mxu0 %v3504_v0 }
 0x1b9   :  { %1618 = vmatpush1.bf16.msra.mxu1 %v3349_v36  ;;  %v2025_v36 = vrot.slane %v2016_v8, %v814_v26  ;;  %v3431_v8 = vld [vmem:[%s4426_s5] sm:$0xff]  }
 0x1ba   :  { %1619 = vmatprep.subr.bf16.mxu1 %v3354_v6  ;;  %3083 = vmatpush3.bf16.msra.mxu0 %v3425_v25 }
 0x1bb   :  { %3084 = vmatprep.subr.bf16.mxu0 %v3504_v0 }
 0x1bd   :  { %1620 = vmatpush1.bf16.msra.mxu1 %v3352_v18 }
 0x1be   :  { %1621 = vmatprep.subr.bf16.mxu1 %v3357_v14  ;;  %3085 = vmatpush3.bf16.msra.mxu0 %v3427_v32 }
 0x1bf   :  { %3086 = vmatprep.subr.bf16.mxu0 %v3504_v0 }
 0x1c1   :  { %1622 = vmatpush1.bf16.msra.mxu1 %v3355_v30 }
 0x1c2   :  { %1623 = vmatprep.subr.bf16.mxu1 %v3360_v19  ;;  %3087 = vmatpush3.bf16.msra.mxu0 %v3429_v53 }
 0x1c3   :  { %3092 = vmatprep.subr.bf16.mxu0 %v3504_v0 }
 0x1c5   :  { %1624 = vmatpush1.bf16.msra.mxu1 %v3358_v46 }
 0x1c6   :  { %1625 = vmatprep.subr.bf16.mxu1 %v3363_v9 }
 0x1c9   :  { %1626 = vmatpush1.bf16.msra.mxu1 %v3361_v21 }
 0x1ca   :  { %1627 = vmatprep.subr.bf16.mxu1 %v3366_v29 }
 0x1cd   :  { %1628 = vmatpush1.bf16.msra.mxu1 %v3364_v28 }
 0x1ce   :  { %1791 = vmatprep.subr.bf16.mxu1 %v3369_v31 }
 0x1d0   :  { %1646 = vmatmul.mubr.bf16.vlgmr.msra.gmra.mrb[0].mxu1 %v1531_v52  ;;  %v3385_v52 = vld [vmem:[#allocation2 + $0x1e0] ss:$8 sps:$4 sm:$0xff]  }
 0x1d1   :  { %1792 = vmatpush1.bf16.msra.mxu1 %v3367_v43  ;;  %1823 = vmatprep.mubr.bf16.mxu1 %v3506_v20 }
 0x1d2   :  { %1793 = vmatprep.subr.bf16.mxu1 %v3372_v54 }
 0x1d5   :  { %1794 = vmatpush1.bf16.msra.mxu1 %v3370_v2 }
 0x1d6   :  { %1795 = vmatprep.subr.bf16.mxu1 %v3375_v5 }
 0x1d9   :  { %1796 = vmatpush1.bf16.msra.mxu1 %v3373_v7 }
 0x1da   :  { %1797 = vmatprep.subr.bf16.mxu1 %v3378_v17 }
 0x1dd   :  { %1798 = vmatpush1.bf16.msra.mxu1 %v3376_v39 }
 0x1de   :  { %1799 = vmatprep.subr.bf16.mxu1 %v3381_v1 }
 0x1e1   :  { %1800 = vmatpush1.bf16.msra.mxu1 %v3379_v50 }
 0x1e2   :  { %1801 = vmatprep.subr.bf16.mxu1 %v3384_v10 }
 0x1e5   :  { %1802 = vmatpush1.bf16.msra.mxu1 %v3382_v33 }
 0x1e6   :  { %1803 = vmatprep.subr.bf16.mxu1 %v3387_v44 }
 0x1e9   :  { %1804 = vmatpush1.bf16.msra.mxu1 %v3385_v52 }
 0x1ea   :  { %1805 = vmatprep.subr.bf16.mxu1 %v3390_v55 }
 0x1ed   :  { %1806 = vmatpush1.bf16.msra.mxu1 %v3388_v42 }
 0x1ee   :  { %1969 = vmatprep.subr.bf16.mxu1 %v3393_v16 }
 0x1f0   :  { %1824 = vmatmul.mubr.bf16.vlgmr.msra.gmra.mrb[0].mxu1 %v1709_v37  ;;  %v3414_v37 = vld [vmem:[#allocation2 + $0x274] ss:$8 sps:$4 sm:$0xff]  }
 0x1f1   :  { %1970 = vmatpush1.bf16.msra.mxu1 %v3391_v48  ;;  %2001 = vmatprep.mubr.bf16.mxu1 %v3506_v20  ;;  %v3409_v20 = vld [vmem:[#allocation2 + $0x260] ss:$8 sps:$4 sm:$0xff]  }
 0x1f2   :  { %1971 = vmatprep.subr.bf16.mxu1 %v3396_v57 }
 0x1f5   :  { %1972 = vmatpush1.bf16.msra.mxu1 %v3394_v60 }
 0x1f6   :  { %1973 = vmatprep.subr.bf16.mxu1 %v3399_v49 }
 0x1f9   :  { %1974 = vmatpush1.bf16.msra.mxu1 %v3397_v56 }
 0x1fa   :  { %1975 = vmatprep.subr.bf16.mxu1 %v3402_v35 }
 0x1fd   :  { %1976 = vmatpush1.bf16.msra.mxu1 %v3400_v15 }
 0x1fe   :  { %1977 = vmatprep.subr.bf16.mxu1 %v3405_v47 }
 0x201   :  { %1978 = vmatpush1.bf16.msra.mxu1 %v3403_v51 }
 0x202   :  { %1979 = vmatprep.subr.bf16.mxu1 %v3408_v45 }
 0x205   :  { %1980 = vmatpush1.bf16.msra.mxu1 %v3406_v23 }
 0x206   :  { %1981 = vmatprep.subr.bf16.mxu1 %v3411_v38 }
 0x209   :  { %1982 = vmatpush1.bf16.msra.mxu1 %v3409_v20 }
 0x20a   :  { %1983 = vmatprep.subr.bf16.mxu1 %v3414_v37 }
 0x20d   :  { %1984 = vmatpush1.bf16.msra.mxu1 %v3412_v58 }
 0x20e   :  { %3112 = vmatprep.subr.bf16.mxu1 %v3504_v0 }
 0x210   :  { %2002 = vmatmul.mubr.bf16.vlgmr.msra.gmra.mrb[0].mxu1 %v1887_v27  ;;  %v3426_v27 = vld [vmem:[%s4426_s5 + $0xa8] sm:$0xff]  }
 0x211   :  { %3113 = vmatpush3.bf16.msra.mxu1 %v3416_v59  ;;  %3128 = vmatprep.mubr.msk.bf16.mxu1 %vm3508_vm14, %v3504_v0 }
 0x212   :  { %3114 = vmatprep.subr.bf16.mxu1 %v3504_v0 }
 0x215   :  { %3115 = vmatpush3.bf16.msra.mxu1 %v3418_v62 }
 0x216   :  { %3116 = vmatprep.subr.bf16.mxu1 %v3504_v0 }
 0x219   :  { %3117 = vmatpush3.bf16.msra.mxu1 %v3420_v12 }
 0x21a   :  { %3118 = vmatprep.subr.bf16.mxu1 %v3504_v0 }
 0x21d   :  { %3119 = vmatpush3.bf16.msra.mxu1 %v3422_v3 }
 0x21e   :  { %3120 = vmatprep.subr.bf16.mxu1 %v3504_v0 }
 0x221   :  { %3121 = vmatpush3.bf16.msra.mxu1 %v3424_v61 }
 0x222   :  { %3122 = vmatprep.subr.bf16.mxu1 %v3504_v0 }
 0x225   :  { %3123 = vmatpush3.bf16.msra.mxu1 %v3426_v27 }
 0x226   :  { %3124 = vmatprep.subr.bf16.mxu1 %v3504_v0 }
 0x229   :  { %3125 = vmatpush3.bf16.msra.mxu1 %v3428_v40 }
 0x22a   :  { %3126 = vmatprep.subr.bf16.mxu1 %v3504_v0 }
 0x22d   :  { %3127 = vmatpush3.bf16.msra.mxu1 %v3430_v4 }
 0x22e   :  { %3152 = vmatprep.subr.bf16.mxu1 %v3504_v0 }
 0x2e3   :  { %v2003_v6 = vpop.f32.mrb[0].mxu1 }
 0x2e4   :  { %v2028_v18 = vadd.f32 %v2021_v11, %v2003_v6  ;;  %v2005_v14 = vpop.f32.mrb[1].mxu1 }
 0x2e5   :  { %v2029_v30 = vadd.f32 %v2025_v36, %v2005_v14  ;;  %v2007_v19 = vpop.f32.mrb[2].mxu1 }
 0x2e6   :  { %v2032_v46 = vmax.f32 %v2028_v18, 0.0  ;;  %v2030_v9 = vadd.f32 %v2021_v11, %v2007_v19  ;;  %v2009_v21 = vpop.f32.mrb[3].mxu1  ;;  %v3432_v19 = vld [vmem:[%s4426_s5 + $0x8] sm:$0xff]  }
 0x2e7   :  { %v2033_v29 = vmax.f32 %v2029_v30, 0.0  ;;  %v2031_v28 = vadd.f32 %v2025_v36, %v2009_v21  ;;  %v3435_v21 = vld [vmem:[%s4426_s5 + $0x20] sm:$0xff]  }
 0x2e8   :  { %v2034_v31 = vmax.f32 %v2030_v9, 0.0  ;;  %v3434_v9 = vld [vmem:[%s4426_s5 + $0x18] sm:$0xff]  }
 0x2e9   :  { %v2036_v43 = vmax.f32 %v2032_v46, %v2033_v29  ;;  %v2035_v54 = vmax.f32 %v2031_v28, 0.0  ;;  %v3433_v46 = vld [vmem:[%s4426_s5 + $0x10] sm:$0xff]   ;;  %v3436_v29 = vld [vmem:[%s4426_s5 + $0x28] sm:$0xff]  }
 0x2ea   :  { %v3437_v28 = vld [vmem:[%s4426_s5 + $0x30] sm:$0xff]  }
 0x2eb   :  { %v2040_v2 = vcombine.high %v2036_v43, %v2036_v43  ;;  %v2047_v5 = vrot.slane %v2036_v43, %v3945_v41  ;;  %v2037_v24 = vmax.f32 %v2034_v31, %v2035_v54  ;;  %v3438_v31 = vld [vmem:[%s4426_s5 + $0x38] sm:$0xff]   ;;  %v3439_v43 = vld [vmem:[%s4426_s5 + $0xc0] sm:$0xff]  }
 0x2ed   :  { %v2054_v22 = vrot.slane %v2040_v2, %v3945_v41  ;;  %v2055_v26 = vcombine.high %v2047_v5, %v2047_v5  ;;  %v2929_v7 = vrot.slane %v2047_v5, 9  ;;  %v2057_v17 = vcombine.high %v2037_v24, %v2037_v24  ;;  %v3440_v2 = vld [vmem:[%s4426_s5 + $0xc8] sm:$0xff]  }
 0x2ee   :  { %v2064_v39 = vrot.slane %v2037_v24, %v3945_v41  ;;  %v3442_v24 = vld [vmem:[%s4426_s5 + $0xd8] sm:$0xff]  }
 0x2ef   :  { %v2056_v1 = vcombine.high %v2054_v22, %v2054_v22  ;;  %v2930_v50 = vrot.slane %v2055_v26, 9  ;;  %v2931_v10 = vrot.slane %v2054_v22, 9  ;;  %v2106_v33 = vmax.f32 %v2047_v5, %v2929_v7  ;;  %v3441_v5 = vld [vmem:[%s4426_s5 + $0xd0] sm:$0xff]  }
 0x2f0   :  { %v2071_v44 = vrot.slane %v2057_v17, %v3945_v41  ;;  %v2072_v52 = vcombine.high %v2064_v39, %v2064_v39  ;;  %v2933_v55 = vrot.slane %v2064_v39, 9  ;;  %v3445_v7 = vld [vmem:[%s4426_s5 + $0xf0] sm:$0xff]   ;;  %v3446_v17 = vld [vmem:[%s4426_s5 + $0xf8] sm:$0xff]  }
 0x2f1   :  { %v2932_v42 = vrot.slane %v2056_v1, 9  ;;  %v2107_v16 = vmax.f32 %v2055_v26, %v2930_v50  ;;  %v2108_v48 = vmax.f32 %v2054_v22, %v2931_v10  ;;  %v2114_v35 = vpack.c.bf16 %v2106_v33, %v2106_v33  ;;  %v3443_v22 = vld [vmem:[%s4426_s5 + $0xe0] sm:$0xff]   ;;  %v3444_v26 = vld [vmem:[%s4426_s5 + $0xe8] sm:$0xff]   ;;  %v3449_v10 = vld [vmem:[%s4428_s7 + $0x10] sm:$0xff]  }
 0x2f2   :  { %v2073_v57 = vcombine.high %v2071_v44, %v2071_v44  ;;  %v2934_v60 = vrot.slane %v2072_v52, 9  ;;  %v2935_v49 = vrot.slane %v2071_v44, 9  ;;  %v2110_v56 = vmax.f32 %v2064_v39, %v2933_v55  ;;  %v3448_v50 = vld [vmem:[%s4428_s7 + $0x8] sm:$0xff]   ;;  %v3450_v33 = vld [vmem:[%s4428_s7 + $0x18] sm:$0xff]  }
 0x2f3   :  { %v2109_v15 = vmax.f32 %v2056_v1, %v2932_v42  ;;  %v2115_v38 = vpack.c.bf16 %v2107_v16, %v2107_v16  ;;  %v2116_v20 = vpack.c.bf16 %v2108_v48, %v2108_v48  ;;  %v2253_v62 = vunpack.c.l.b16 %v2114_v35  ;;  %v3447_v1 = vld [vmem:[%s4428_s7] sm:$0xff]  }
 0x2f4   :  { %v2936_v47 = vrot.slane %v2073_v57, 9  ;;  %v2111_v51 = vmax.f32 %v2072_v52, %v2934_v60  ;;  %v2112_v45 = vmax.f32 %v2071_v44, %v2935_v49  ;;  %v2118_v23 = vpack.c.bf16 %v2110_v56, %v2110_v56 }
 0x2f5   :  { %v2117_v63 = vpack.c.bf16 %v2109_v15, %v2109_v15  ;;  %v2157_v61 = vunpack.c.l.b16 %v2115_v38  ;;  %v2366_v25 = vunpack.c.l.b16 %v2116_v20 }
 0x2f6   :  { %v2113_v37 = vmax.f32 %v2073_v57, %v2936_v47  ;;  %v2119_v58 = vpack.c.bf16 %v2111_v51, %v2111_v51  ;;  %v2120_v41 = vpack.c.bf16 %v2112_v45, %v2112_v45  ;;  %v2254_v59 = vunpack.c.l.b16 %v2118_v23  ;;  %v3017_v23 = vld [vmem:[%s4427_s6] ss:$0 sm:$0xff] }
 0x2f7   :  { %v2480_v36 = vunpack.c.l.b16 %v2117_v63  ;;  %v3451_v63 = vld [vmem:[%s4430_s9] sm:$0xff]  }
 0x2f8   :  { %v2158_v12 = vunpack.c.l.b16 %v2119_v58  ;;  %v2255_v13 = vrot.slane %v2254_v59, 7  ;;  %v2367_v3 = vunpack.c.l.b16 %v2120_v41  ;;  %v2121_v34 = vpack.c.bf16 %v2113_v37, %v2113_v37 }
 0x2fa   :  { %v2159_v27 = vrot.slane %v2158_v12, 7  ;;  %v2368_v32 = vrot.slane %v2367_v3, 7  ;;  %v2256_v40 = vsel %vm1166_vm7, %v2255_v13, %v2253_v62  ;;  %v2481_v53 = vunpack.c.l.b16 %v2121_v34  ;;  %v3452_v12 = vld [vmem:[%s4430_s9 + $0x8] sm:$0xff]   ;;  %v3018_v13 = vld [vmem:[%s4429_s8] ss:$0 sm:$0xff]  ;;  %s3509_s9 = smov [#allocation5]  }
 0x2fb   :  { %v2257_v54 = vpack.c.b16 %v2256_v40, %v2256_v40  ;;  %s2744_s15 = sshll.u32 %s3509_s9, 4  ;;  %s2745_s15 = int_to_ptr.vmem [resolvable:$true] %s2744_s15 }
 0x2fc   :  { %v2160_v4 = vsel %vm1166_vm7, %v2159_v27, %v2157_v61  ;;  %v2369_v11 = vsel %vm1166_vm7, %v2368_v32, %v2366_v25  ;;  %v2482_v6 = vrot.slane %v2481_v53, 7  ;;  %v3024_v53 = vld [vmem:[%s4431_s10] ss:$0 sm:$0xff]  ;;  %s3475_s8 = scalar_lea.vmem %s2745_s15, 32  ;;  %p3480_p9 = scmp.lt.s32.totalorder %s2745_s15, %s2745_s15 }
 0x2fd   :  { %v2161_v18 = vpack.c.b16 %v2160_v4, %v2160_v4  ;;  %v2370_v14 = vpack.c.b16 %v2369_v11, %v2369_v11  ;;  %p3476_p8 = scmp.ne.s32.totalorder %s2745_s15, %s3475_s8  ;;  %p3481_p10 = scmp.lt.s32.totalorder %s3475_s8, %s3475_s8 }
 0x2fe   :  { %v2483_v30 = vsel %vm1166_vm7, %v2482_v6, %v2480_v36 }
 0x2ff   :  { %3089 = vmatmul.mubr.bf16.vlgmr.msra.gmra.mrb[12].mxu0 %v2161_v18  ;;  %3129 = vmatmul.mubr.bf16.vlgmr.msra.gmra.mrb[4].mxu1 %v2370_v14  ;;  %v2484_v39 = vpack.c.b16 %v2483_v30, %v2483_v30  ;;  %p3482_p11 = por %p3481_p10, %p3480_p9 }
 0x300   :  { %3093 = vmatpush3.bf16.msra.mxu0 %v3431_v8  ;;  %3108 = vmatprep.mubr.msk.bf16.mxu0 %vm3508_vm14, %v3504_v0 }
 0x301   :  { %3094 = vmatprep.subr.bf16.mxu0 %v3504_v0  ;;  %3160 = vmatprep.mubr.msk.bf16.mxu1 %vm3508_vm14, %v3504_v0  ;;  %p3483_p12 = pnand %p3482_p11, %p3476_p8 }
 0x302   :  { %3153 = vmatpush3.bf16.msra.mxu1 %v3447_v1 }
 0x303   :  { %3154 = vmatprep.subr.bf16.mxu1 %v3504_v0 }
 0x304   :  { %3095 = vmatpush3.bf16.msra.mxu0 %v3432_v19 }
 0x305   :  { %3096 = vmatprep.subr.bf16.mxu0 %v3504_v0 }
 0x306   :  { %3155 = vmatpush3.bf16.msra.mxu1 %v3448_v50 }
 0x307   :  { %3156 = vmatprep.subr.bf16.mxu1 %v3504_v0 }
 0x308   :  { %3097 = vmatpush3.bf16.msra.mxu0 %v3433_v46 }
 0x309   :  { %3098 = vmatprep.subr.bf16.mxu0 %v3504_v0 }
 0x30a   :  { %3157 = vmatpush3.bf16.msra.mxu1 %v3449_v10 }
 0x30b   :  { %3158 = vmatprep.subr.bf16.mxu1 %v3504_v0 }
 0x30c   :  { %3099 = vmatpush3.bf16.msra.mxu0 %v3434_v9 }
 0x30d   :  { %3100 = vmatprep.subr.bf16.mxu0 %v3504_v0 }
 0x30e   :  { %3159 = vmatpush3.bf16.msra.mxu1 %v3450_v33 }
 0x310   :  { %3101 = vmatpush3.bf16.msra.mxu0 %v3435_v21 }
 0x311   :  { %3102 = vmatprep.subr.bf16.mxu0 %v3504_v0 }
 0x314   :  { %3103 = vmatpush3.bf16.msra.mxu0 %v3436_v29 }
 0x315   :  { %3104 = vmatprep.subr.bf16.mxu0 %v3504_v0 }
 0x318   :  { %3105 = vmatpush3.bf16.msra.mxu0 %v3437_v28 }
 0x319   :  { %3106 = vmatprep.subr.bf16.mxu0 %v3504_v0 }
 0x31c   :  { %3107 = vmatpush3.bf16.msra.mxu0 %v3438_v31 }
 0x31d   :  { %3132 = vmatprep.subr.bf16.mxu0 %v3504_v0 }
 0x31f   :  { %3109 = vmatmul.mubr.bf16.vlgmr.msra.gmra.mrb[16].mxu0 %v2257_v54 }
 0x320   :  { %3133 = vmatpush3.bf16.msra.mxu0 %v3439_v43  ;;  %3148 = vmatprep.mubr.msk.bf16.mxu0 %vm3508_vm14, %v3504_v0 }
 0x321   :  { %3134 = vmatprep.subr.bf16.mxu0 %v3504_v0 }
 0x324   :  { %3135 = vmatpush3.bf16.msra.mxu0 %v3440_v2 }
 0x325   :  { %3136 = vmatprep.subr.bf16.mxu0 %v3504_v0 }
 0x328   :  { %3137 = vmatpush3.bf16.msra.mxu0 %v3441_v5 }
 0x329   :  { %3138 = vmatprep.subr.bf16.mxu0 %v3504_v0 }
 0x32c   :  { %3139 = vmatpush3.bf16.msra.mxu0 %v3442_v24 }
 0x32d   :  { %3140 = vmatprep.subr.bf16.mxu0 %v3504_v0 }
 0x330   :  { %3141 = vmatpush3.bf16.msra.mxu0 %v3443_v22 }
 0x331   :  { %3142 = vmatprep.subr.bf16.mxu0 %v3504_v0 }
 0x334   :  { %3143 = vmatpush3.bf16.msra.mxu0 %v3444_v26 }
 0x335   :  { %3144 = vmatprep.subr.bf16.mxu0 %v3504_v0 }
 0x338   :  { %3145 = vmatpush3.bf16.msra.mxu0 %v3445_v7 }
 0x339   :  { %3146 = vmatprep.subr.bf16.mxu0 %v3504_v0 }
 0x33c   :  { %3147 = vmatpush3.bf16.msra.mxu0 %v3446_v17 }
 0x33d   :  { %3164 = vmatprep.subr.bf16.mxu0 %v3504_v0 }
 0x33f   :  { %3149 = vmatmul.mubr.bf16.vlgmr.msra.gmra.mrb[20].mxu0 %v2484_v39 }
 0x340   :  { %3168 = vmatprep.mubr.msk.bf16.mxu0 %vm3508_vm14, %v3504_v0  ;;  %3165 = vmatpush3.bf16.msra.mxu0 %v3451_v63 }
 0x341   :  { %3166 = vmatprep.subr.bf16.mxu0 %v3504_v0 }
 0x344   :  { %3167 = vmatpush3.bf16.msra.mxu0 %v3452_v12 }
 0x3d2   :  { %v2245_v44 = vpop.f32.mrb[12].mxu0  ;;  %v2454_v52 = vpop.f32.mrb[4].mxu1 }
 0x3d3   :  { %v3090_v55 = vpop.f32.mrb[13].mxu0  ;;  %v3130_v42 = vpop.f32.mrb[5].mxu1 }
 0x3d4   :  { %v2248_v16 = vpop.f32.mrb[14].mxu0  ;;  %v2457_v48 = vpop.f32.mrb[6].mxu1 }
 0x3d5   :  { %v3091_v57 = vpop.f32.mrb[15].mxu0  ;;  %v3131_v60 = vpop.f32.mrb[7].mxu1 }
 0x3f2   :  { %v2341_v49 = vpop.f32.mrb[16].mxu0 }
 0x3f3   :  { %v2342_v56 = vadd.f32 %v2341_v49, %v2245_v44  ;;  %v3110_v35 = vpop.f32.mrb[17].mxu0 }
 0x3f4   :  { %v2344_v15 = vpop.f32.mrb[18].mxu0 }
 0x3f5   :  { %v3111_v47 = vpop.f32.mrb[19].mxu0  ;;  %v2460_v51 = vadd.f32 %v2454_v52, %v2342_v56 }
 0x412   :  { %v2568_v45 = vpop.f32.mrb[20].mxu0 }
 0x413   :  { %v2574_v38 = vadd.f32 %v2568_v45, %v2460_v51  ;;  %v3150_v20 = vpop.f32.mrb[21].mxu0 }
 0x414   :  { %v2571_v37 = vpop.f32.mrb[22].mxu0 }
 0x415   :  { %v2582_v58 = vadd.f32 %v3017_v23, %v2574_v38  ;;  %v3151_v41 = vpop.f32.mrb[23].mxu0 }
 0x417   :  { %v2583_v59 = vmax.f32 %v2582_v58, 0.0 }
 0x419   :  { %v2584_v62 = vpack.c.bf16 %v2583_v59, %v2583_v59 }
 0x41b   :  { %3161 = vmatmul.mubr.msk.bf16.vlgmr.msra.gmra.mrb[8].mxu1 %vm2624_vm15, %v2584_v62 }
 0x4ee   :  { %v2662_v3 = vpop.f32.mrb[8].mxu1 }
 0x4ef   :  { %v2663_v34 = vadd.f32 %v3018_v13, %v2662_v3  ;;  %v3162_v61 = vpop.f32.mrb[9].mxu1 }
 0x4f0   :  { %v2665_v25 = vpop.f32.mrb[10].mxu1 }
 0x4f1   :  { %v2668_v27 = vmax.f32 %v2663_v34, 0.0  ;;  %v3163_v32 = vpop.f32.mrb[11].mxu1 }
 0x4f3   :  { %v2669_v40 = vpack.c.bf16 %v2668_v27, %v2668_v27 }
 0x4f5   :  { %3169 = vmatmul.mubr.msk.bf16.vlgmr.msra.gmra.mrb[24].mxu0 %vm2693_vm0, %v2669_v40 }
 0x5c8   :  { %v2731_v0 = vpop.f32.mrb[24].mxu0 }
 0x5c9   :  { %v2732_v4 = vadd.f32 %v3024_v53, %v2731_v0  ;;  %v3170_v8 = vpop.f32.mrb[25].mxu0 }
 0x5ca   :  { %v2734_v11 = vpop.f32.mrb[26].mxu0 }
 0x5cb   :  { %2737 = vst [vmem:[#allocation5] sm:$0x3] %v2732_v4  ;;  %v3171_v36 = vpop.f32.mrb[27].mxu0 }
 0x5cc   :  { %3486 = shalt.err (!%p3483_p12)
}
 0x5cd   :  { %s3487_s10 = scalar_lea.hbm %s4432_s11, 32 }
 0x5ce   :  { %p3488_p13 = scmp.ne.s32.totalorder %s4432_s11, %s3487_s10  ;;  %p3491_p0 = scmp.lt.u32.totalorder %s3487_s10, %s4432_s11 }
 0x5d0   :  { %p3493_p1 = pnand %p3491_p0, %p3488_p13 }
 0x5d2   :  { %3496 = shalt.err (!%p3493_p1)
}
 0x5d3   :  { %2747 = dma.vmem_to_hbm [thread:$0]  %s2745_s15, 32, %s4432_s11, [#allocation4]  }
 0x5d4   :  { %3499 = dma.done.wait [#allocation4], 32  }
 0x5d5   :  { %3500 = vsyncadd [#allocation4], 4294967264 }
 0x5d6   :  { %2751 = vsyncpa [#allocation3], 1 }
 0x5d7   :  { %2752 = vsyncpa [#allocation4], 1 }

</bundles_post_ra>
